<compile_context>
chip_gen: v5e
topology: v5e:2x2
jax: 0.10.0
libtpu: 0.0.40
codegen_flags: <defaults>
</compile_context>

<pallas_src>
import functools

import jax
import jax.numpy as jnp
from jax import lax
from jax.experimental import pallas as pl
from jax.experimental.pallas import tpu as pltpu


def _round_up(a, b):
    return (a + b - 1) // b * b


def _cell12_kernel(x_ref, l1_ref, l2_ref, inv1_ref, s1_ref, inv2_ref, s2_ref,
                   o1_ref, o2_ref,
                   sum1, min1, max1, sum2, min2, max2,
                   *, C: int, L1: int, L2: int):
    # x_ref   : (N, C, T) f32   pixel tile (pixels on the lane axis)
    # l*_ref  : (N, 1, T) i32   label tiles (padded pixels carry label -1)
    # inv*_ref: (L, 1)    f32   1 / label_size
    # s*_ref  : (L, 1)    f32   exp(-label_size) - 0.5
    # o*_ref  : (L, 3C+1) f32   resident output, written once on the last tile
    # sum/min/max*: (L, C) f32  VMEM accumulators, carried across the pixel grid
    t = pl.program_id(0)

    @pl.when(t == 0)
    def _init():
        sum1[...] = jnp.zeros_like(sum1)
        min1[...] = jnp.full_like(min1, jnp.inf)
        max1[...] = jnp.full_like(max1, -jnp.inf)
        sum2[...] = jnp.zeros_like(sum2)
        min2[...] = jnp.full_like(min2, jnp.inf)
        max2[...] = jnp.full_like(max2, -jnp.inf)

    x = x_ref[...]                                   # (N, C, T) f32
    N = x.shape[0]
    T = x.shape[2]

    def accumulate(lbl_ref, L, sum_acc, min_acc, max_acc):
        lbl = lbl_ref[...]                           # (N, 1, T) i32
        iota = lax.broadcasted_iota(jnp.int32, (N, L, T), 1)
        eq = lbl == iota                             # (N, L, T) bool (one compare/lbl)
        onehot = eq.astype(jnp.float32)              # (N, L, T)

        # ---- per-label sums on the MXU: (L,T) x (C,T)^T -> (L,C), summed over N ----
        s = jnp.zeros((L, C), dtype=jnp.float32)
        for n in range(N):                           # N is small & static
            s = s + lax.dot_general(
                onehot[n], x[n],
                dimension_numbers=(((1,), (1,)), ((), ())),
                preferred_element_type=jnp.float32)
        sum_acc[...] += s

        # ---- per-label min/max on the VPU/XLU (L is small & static) ----
        for l in range(L):
            m = eq[:, l:l + 1, :]                    # (N, 1, T)
            mn = jnp.min(jnp.where(m, x, jnp.inf), axis=2)      # (N, C)
            mn = jnp.min(mn, axis=0, keepdims=True)             # (1, C)
            mx = jnp.max(jnp.where(m, x, -jnp.inf), axis=2)     # (N, C)
            mx = jnp.max(mx, axis=0, keepdims=True)             # (1, C)
            min_acc[l:l + 1, :] = jnp.minimum(min_acc[l:l + 1, :], mn)
            max_acc[l:l + 1, :] = jnp.maximum(max_acc[l:l + 1, :], mx)

    accumulate(l1_ref, L1, sum1, min1, max1)
    accumulate(l2_ref, L2, sum2, min2, max2)

    @pl.when(t == pl.num_programs(0) - 1)
    def _finalize():
        mean1 = sum1[...] * inv1_ref[...]            # (L1, C) * (L1, 1)
        o1_ref[:, 0:C] = mean1
        o1_ref[:, C:2 * C] = min1[...]
        o1_ref[:, 2 * C:3 * C] = max1[...]
        o1_ref[:, 3 * C:3 * C + 1] = s1_ref[...]

        mean2 = sum2[...] * inv2_ref[...]            # (L2, C) * (L2, 1)
        o2_ref[:, 0:C] = mean2
        o2_ref[:, C:2 * C] = min2[...]
        o2_ref[:, 2 * C:3 * C] = max2[...]
        o2_ref[:, 3 * C:3 * C + 1] = s2_ref[...]


def cell12_acc_forward(x, cell_1_mask, cell_2_mask, cell_1_sizes, cell_2_sizes,
                       in_channels, *, pixel_tile=512):
    """JAX/Pallas equivalent of Cell12AccModule.forward (float path).

    x            : (N, C, H, W) float32
    cell_*_mask  : (N, H, W)    int32, values in [0, L*)
    cell_*_sizes : (L*,)        int32, pixel count per label
    returns      : ((L1, 3C+1), (L2, 3C+1)) float32
    """
    N, C, H, W = x.shape
    assert C == in_channels
    L1 = cell_1_sizes.shape[0]
    L2 = cell_2_sizes.shape[0]
    D = 3 * C + 1
    P = H * W

    # Pixel tiling: tile is a multiple of 128; pad P up to a multiple of the tile.
    tile = pixel_tile if P >= pixel_tile else P
    tile = _round_up(max(tile, 128), 128)
    P_pad = _round_up(P, tile)
    num_tiles = P_pad // tile

    xf = x.reshape(N, C, P).astype(jnp.float32)          # pure reshape, no transpose
    l1 = cell_1_mask.reshape(N, 1, P).astype(jnp.int32)
    l2 = cell_2_mask.reshape(N, 1, P).astype(jnp.int32)
    if P_pad != P:
        pad = P_pad - P
        xf = jnp.pad(xf, ((0, 0), (0, 0), (0, pad)))
        l1 = jnp.pad(l1, ((0, 0), (0, 0), (0, pad)), constant_values=-1)
        l2 = jnp.pad(l2, ((0, 0), (0, 0), (0, pad)), constant_values=-1)

    sz1 = cell_1_sizes.astype(jnp.float32)
    sz2 = cell_2_sizes.astype(jnp.float32)
    inv1 = (1.0 / sz1).reshape(L1, 1)
    inv2 = (1.0 / sz2).reshape(L2, 1)
    s1 = (jnp.exp(-sz1) - 0.5).reshape(L1, 1)
    s2 = (jnp.exp(-sz2) - 0.5).reshape(L2, 1)

    kernel = functools.partial(_cell12_kernel, C=C, L1=L1, L2=L2)

    out1, out2 = pl.pallas_call(
        kernel,
        out_shape=(jax.ShapeDtypeStruct((L1, D), jnp.float32),
                   jax.ShapeDtypeStruct((L2, D), jnp.float32)),
        grid_spec=pltpu.PrefetchScalarGridSpec(
            num_scalar_prefetch=0,
            grid=(num_tiles,),
            in_specs=[
                pl.BlockSpec((N, C, tile), lambda t: (0, 0, t)),   # x tile
                pl.BlockSpec((N, 1, tile), lambda t: (0, 0, t)),   # labels mask 1
                pl.BlockSpec((N, 1, tile), lambda t: (0, 0, t)),   # labels mask 2
                pl.BlockSpec((L1, 1), lambda t: (0, 0)),           # 1/size (mask 1)
                pl.BlockSpec((L1, 1), lambda t: (0, 0)),           # exp(-size)-0.5
                pl.BlockSpec((L2, 1), lambda t: (0, 0)),           # 1/size (mask 2)
                pl.BlockSpec((L2, 1), lambda t: (0, 0)),           # exp(-size)-0.5
            ],
            out_specs=[
                pl.BlockSpec((L1, D), lambda t: (0, 0)),           # resident output 1
                pl.BlockSpec((L2, D), lambda t: (0, 0)),           # resident output 2
            ],
            scratch_shapes=[
                pltpu.VMEM((L1, C), jnp.float32),   # sum1
                pltpu.VMEM((L1, C), jnp.float32),   # min1
                pltpu.VMEM((L1, C), jnp.float32),   # max1
                pltpu.VMEM((L2, C), jnp.float32),   # sum2
                pltpu.VMEM((L2, C), jnp.float32),   # min2
                pltpu.VMEM((L2, C), jnp.float32),   # max2
            ]),
        compiler_params=pltpu.CompilerParams(
            dimension_semantics=("arbitrary",)),    # accumulators carried across tiles
    )(xf, l1, l2, inv1, s1, inv2, s2)
    return out1, out2


def _reference(x, labels, sizes):
    # pure-JAX reference for a sanity check
    N, C, H, W = x.shape
    L = sizes.shape[0]
    xf = jnp.transpose(x, (0, 2, 3, 1)).reshape(-1, C)
    lf = labels.reshape(-1)
    mean = jax.ops.segment_sum(xf, lf, num_segments=L) / sizes[:, None].astype(jnp.float32)
    mn = jax.ops.segment_min(xf, lf, num_segments=L)
    mx = jax.ops.segment_max(xf, lf, num_segments=L)
    s = (jnp.exp(-sizes.astype(jnp.float32)) - 0.5)[:, None]
    return jnp.concatenate([mean, mn, mx, s], axis=1)


if __name__ == "__main__":
    key = jax.random.PRNGKey(0)
    k_x, k_p1, k_p2 = jax.random.split(key, 3)

    N, C, H, W = 2, 4, 16, 16          # small NCHW input, in_channels = 4
    L1, L2 = 6, 5                      # number of cells in each mask
    tot = N * H * W

    x = jax.random.normal(k_x, (N, C, H, W), dtype=jnp.float32)

    # deterministic label maps guaranteeing every label is present
    perm1 = jax.random.permutation(k_p1, tot)
    perm2 = jax.random.permutation(k_p2, tot)
    cell_1_mask = (jnp.arange(tot) % L1)[perm1].reshape(N, H, W).astype(jnp.int32)
    cell_2_mask = (jnp.arange(tot) % L2)[perm2].reshape(N, H, W).astype(jnp.int32)
    cell_1_sizes = jnp.bincount(cell_1_mask.reshape(-1), length=L1).astype(jnp.int32)
    cell_2_sizes = jnp.bincount(cell_2_mask.reshape(-1), length=L2).astype(jnp.int32)

    # pixel_tile=128 -> 2 pixel tiles, exercising the streaming accumulation path
    out1, out2 = cell12_acc_forward(x, cell_1_mask, cell_2_mask,
                                    cell_1_sizes, cell_2_sizes, in_channels=C,
                                    pixel_tile=128)
    jax.block_until_ready((out1, out2))

    ref1 = _reference(x, cell_1_mask, cell_1_sizes)
    ref2 = _reference(x, cell_2_mask, cell_2_sizes)
    assert jnp.allclose(out1, ref1, rtol=1e-5, atol=1e-5)
    assert jnp.allclose(out2, ref2, rtol=1e-5, atol=1e-5)

    print("KERNEL_OK")
</pallas_src>

<mosaic_0001>
module attributes {stable_mosaic.version = 11 : i64} {
  func.func @_cell12_kernel(%arg0: i32, %arg1: memref<2x4x128xf32, #tpu.memory_space<vmem>>, %arg2: memref<2x1x128xi32, #tpu.memory_space<vmem>>, %arg3: memref<2x1x128xi32, #tpu.memory_space<vmem>>, %arg4: memref<6x1xf32, #tpu.memory_space<vmem>>, %arg5: memref<6x1xf32, #tpu.memory_space<vmem>>, %arg6: memref<5x1xf32, #tpu.memory_space<vmem>>, %arg7: memref<5x1xf32, #tpu.memory_space<vmem>>, %arg8: memref<6x13xf32, #tpu.memory_space<vmem>>, %arg9: memref<5x13xf32, #tpu.memory_space<vmem>>, %arg10: memref<6x4xf32, #tpu.memory_space<vmem>>, %arg11: memref<6x4xf32, #tpu.memory_space<vmem>>, %arg12: memref<6x4xf32, #tpu.memory_space<vmem>>, %arg13: memref<5x4xf32, #tpu.memory_space<vmem>>, %arg14: memref<5x4xf32, #tpu.memory_space<vmem>>, %arg15: memref<5x4xf32, #tpu.memory_space<vmem>>) attributes {dimension_semantics = [#tpu.dimension_semantics<arbitrary>], iteration_bounds = array<i64: 2>, scalar_prefetch = 0 : i64, scratch_operands = 6 : i64, tpu.core_type = #tpu.core_type<tc>, window_params = [{transform_indices = @transform_0, window_bounds = array<i64: 2, 4, 128>}, {transform_indices = @transform_1, window_bounds = array<i64: 2, 1, 128>}, {transform_indices = @transform_2, window_bounds = array<i64: 2, 1, 128>}, {pipeline_mode = #tpu.pipeline_mode<synchronous>, transform_indices = @transform_3, window_bounds = array<i64: 6, 1>}, {pipeline_mode = #tpu.pipeline_mode<synchronous>, transform_indices = @transform_4, window_bounds = array<i64: 6, 1>}, {pipeline_mode = #tpu.pipeline_mode<synchronous>, transform_indices = @transform_5, window_bounds = array<i64: 5, 1>}, {pipeline_mode = #tpu.pipeline_mode<synchronous>, transform_indices = @transform_6, window_bounds = array<i64: 5, 1>}, {pipeline_mode = #tpu.pipeline_mode<synchronous>, transform_indices = @transform_7, window_bounds = array<i64: 6, 13>}, {pipeline_mode = #tpu.pipeline_mode<synchronous>, transform_indices = @transform_8, window_bounds = array<i64: 5, 13>}]} {
    %c0_i32 = arith.constant 0 : i32
    %0 = arith.cmpi eq, %arg0, %c0_i32 : i32
    %1 = arith.extui %0 : i1 to i32
    %c0_i32_0 = arith.constant 0 : i32
    %2 = arith.cmpi ne, %1, %c0_i32_0 : i32
    scf.if %2 {
      %cst_172 = arith.constant 0.000000e+00 : f32
      %282 = vector.broadcast %cst_172 : f32 to vector<6x4xf32>
      %c0_173 = arith.constant 0 : index
      %c0_174 = arith.constant 0 : index
      %283 = vector.load %arg10[%c0_173, %c0_174] : memref<6x4xf32, #tpu.memory_space<vmem>>, vector<6x4xf32>
      tpu.vector_store %arg10[%c0_173, %c0_174], %282 {strides = array<i32>} : memref<6x4xf32, #tpu.memory_space<vmem>>, vector<6x4xf32>,
      %cst_175 = arith.constant 0x7F800000 : f32
      %284 = vector.broadcast %cst_175 : f32 to vector<6x4xf32>
      %c0_176 = arith.constant 0 : index
      %c0_177 = arith.constant 0 : index
      %285 = vector.load %arg11[%c0_176, %c0_177] : memref<6x4xf32, #tpu.memory_space<vmem>>, vector<6x4xf32>
      tpu.vector_store %arg11[%c0_176, %c0_177], %284 {strides = array<i32>} : memref<6x4xf32, #tpu.memory_space<vmem>>, vector<6x4xf32>,
      %cst_178 = arith.constant 0xFF800000 : f32
      %286 = vector.broadcast %cst_178 : f32 to vector<6x4xf32>
      %c0_179 = arith.constant 0 : index
      %c0_180 = arith.constant 0 : index
      %287 = vector.load %arg12[%c0_179, %c0_180] : memref<6x4xf32, #tpu.memory_space<vmem>>, vector<6x4xf32>
      tpu.vector_store %arg12[%c0_179, %c0_180], %286 {strides = array<i32>} : memref<6x4xf32, #tpu.memory_space<vmem>>, vector<6x4xf32>,
      %cst_181 = arith.constant 0.000000e+00 : f32
      %288 = vector.broadcast %cst_181 : f32 to vector<5x4xf32>
      %c0_182 = arith.constant 0 : index
      %c0_183 = arith.constant 0 : index
      %289 = vector.load %arg13[%c0_182, %c0_183] : memref<5x4xf32, #tpu.memory_space<vmem>>, vector<5x4xf32>
      tpu.vector_store %arg13[%c0_182, %c0_183], %288 {strides = array<i32>} : memref<5x4xf32, #tpu.memory_space<vmem>>, vector<5x4xf32>,
      %cst_184 = arith.constant 0x7F800000 : f32
      %290 = vector.broadcast %cst_184 : f32 to vector<5x4xf32>
      %c0_185 = arith.constant 0 : index
      %c0_186 = arith.constant 0 : index
      %291 = vector.load %arg14[%c0_185, %c0_186] : memref<5x4xf32, #tpu.memory_space<vmem>>, vector<5x4xf32>
      tpu.vector_store %arg14[%c0_185, %c0_186], %290 {strides = array<i32>} : memref<5x4xf32, #tpu.memory_space<vmem>>, vector<5x4xf32>,
      %cst_187 = arith.constant 0xFF800000 : f32
      %292 = vector.broadcast %cst_187 : f32 to vector<5x4xf32>
      %c0_188 = arith.constant 0 : index
      %c0_189 = arith.constant 0 : index
      %293 = vector.load %arg15[%c0_188, %c0_189] : memref<5x4xf32, #tpu.memory_space<vmem>>, vector<5x4xf32>
      tpu.vector_store %arg15[%c0_188, %c0_189], %292 {strides = array<i32>} : memref<5x4xf32, #tpu.memory_space<vmem>>, vector<5x4xf32>,
    } else {
    }
    %c0 = arith.constant 0 : index
    %c0_1 = arith.constant 0 : index
    %c0_2 = arith.constant 0 : index
    %3 = vector.load %arg1[%c0, %c0_1, %c0_2] : memref<2x4x128xf32, #tpu.memory_space<vmem>>, vector<2x4x128xf32>
    %c0_3 = arith.constant 0 : index
    %c0_4 = arith.constant 0 : index
    %c0_5 = arith.constant 0 : index
    %4 = vector.load %arg2[%c0_3, %c0_4, %c0_5] : memref<2x1x128xi32, #tpu.memory_space<vmem>>, vector<2x1x128xi32>
    %5 = tpu.iota {dimensions = array<i32: 1>} : vector<2x6x128xi32>
    %6 = vector.broadcast %4 : vector<2x1x128xi32> to vector<2x6x128xi32>
    %7 = arith.cmpi eq, %6, %5 : vector<2x6x128xi32>
    %8 = arith.extui %7 : vector<2x6x128xi1> to vector<2x6x128xi32>
    %9 = arith.sitofp %8 : vector<2x6x128xi32> to vector<2x6x128xf32>
    %cst = arith.constant 0.000000e+00 : f32
    %10 = vector.broadcast %cst : f32 to vector<6x4xf32>
    %11 = vector.extract_strided_slice %9 {offsets = [0, 0, 0], sizes = [1, 6, 128], strides = [1, 1, 1]} : vector<2x6x128xf32> to vector<1x6x128xf32>
    %12 = vector.shape_cast %11 : vector<1x6x128xf32> to vector<6x128xf32>
    %13 = vector.extract_strided_slice %3 {offsets = [0, 0, 0], sizes = [1, 4, 128], strides = [1, 1, 1]} : vector<2x4x128xf32> to vector<1x4x128xf32>
    %14 = vector.shape_cast %13 : vector<1x4x128xf32> to vector<4x128xf32>
    %cst_6 = arith.constant dense<0.000000e+00> : vector<6x4xf32>
    %15 = tpu.matmul %12, %14, %cst_6 {dimension_numbers = #tpu.dot_dimension_numbers<[1], [1], [0], [0], [0, 0, 1, 0], [], []>} : vector<6x128xf32>, vector<4x128xf32>, vector<6x4xf32> -> vector<6x4xf32>
    %16 = arith.addf %10, %15 : vector<6x4xf32>
    %17 = vector.extract_strided_slice %9 {offsets = [1, 0, 0], sizes = [1, 6, 128], strides = [1, 1, 1]} : vector<2x6x128xf32> to vector<1x6x128xf32>
    %18 = vector.shape_cast %17 : vector<1x6x128xf32> to vector<6x128xf32>
    %19 = vector.extract_strided_slice %3 {offsets = [1, 0, 0], sizes = [1, 4, 128], strides = [1, 1, 1]} : vector<2x4x128xf32> to vector<1x4x128xf32>
    %20 = vector.shape_cast %19 : vector<1x4x128xf32> to vector<4x128xf32>
    %cst_7 = arith.constant dense<0.000000e+00> : vector<6x4xf32>
    %21 = tpu.matmul %18, %20, %cst_7 {dimension_numbers = #tpu.dot_dimension_numbers<[1], [1], [0], [0], [0, 0, 1, 0], [], []>} : vector<6x128xf32>, vector<4x128xf32>, vector<6x4xf32> -> vector<6x4xf32>
    %22 = arith.addf %16, %21 : vector<6x4xf32>
    %c0_8 = arith.constant 0 : index
    %c0_9 = arith.constant 0 : index
    %23 = vector.load %arg10[%c0_8, %c0_9] : memref<6x4xf32, #tpu.memory_space<vmem>>, vector<6x4xf32>
    %24 = arith.addf %23, %22 : vector<6x4xf32>
    %c0_10 = arith.constant 0 : index
    %c0_11 = arith.constant 0 : index
    %25 = vector.load %arg10[%c0_10, %c0_11] : memref<6x4xf32, #tpu.memory_space<vmem>>, vector<6x4xf32>
    tpu.vector_store %arg10[%c0_10, %c0_11], %24 {strides = array<i32>} : memref<6x4xf32, #tpu.memory_space<vmem>>, vector<6x4xf32>,
    %26 = vector.extract_strided_slice %7 {offsets = [0, 0, 0], sizes = [2, 1, 128], strides = [1, 1, 1]} : vector<2x6x128xi1> to vector<2x1x128xi1>
    %cst_12 = arith.constant 0x7F800000 : f32
    %27 = vector.shape_cast %26 : vector<2x1x128xi1> to vector<2x1x128xi1>
    %28 = vector.broadcast %27 : vector<2x1x128xi1> to vector<2x4x128xi1>
    %29 = vector.broadcast %cst_12 : f32 to vector<2x4x128xf32>
    %30 = arith.select %28, %3, %29 : vector<2x4x128xi1>, vector<2x4x128xf32>
    %cst_13 = arith.constant dense<0x7F800000> : vector<2x4xf32>
    %31 = vector.multi_reduction <minimumf>, %30, %cst_13 [2] : vector<2x4x128xf32> to vector<2x4xf32>
    %cst_14 = arith.constant dense<0x7F800000> : vector<4xf32>
    %32 = vector.multi_reduction <minimumf>, %31, %cst_14 [0] : vector<2x4xf32> to vector<4xf32>
    %33 = vector.shape_cast %32 : vector<4xf32> to vector<1x4xf32>
    %cst_15 = arith.constant 0xFF800000 : f32
    %34 = vector.shape_cast %26 : vector<2x1x128xi1> to vector<2x1x128xi1>
    %35 = vector.broadcast %34 : vector<2x1x128xi1> to vector<2x4x128xi1>
    %36 = vector.broadcast %cst_15 : f32 to vector<2x4x128xf32>
    %37 = arith.select %35, %3, %36 : vector<2x4x128xi1>, vector<2x4x128xf32>
    %cst_16 = arith.constant dense<0xFF800000> : vector<2x4xf32>
    %38 = vector.multi_reduction <maximumf>, %37, %cst_16 [2] : vector<2x4x128xf32> to vector<2x4xf32>
    %cst_17 = arith.constant dense<0xFF800000> : vector<4xf32>
    %39 = vector.multi_reduction <maximumf>, %38, %cst_17 [0] : vector<2x4xf32> to vector<4xf32>
    %40 = vector.shape_cast %39 : vector<4xf32> to vector<1x4xf32>
    %c0_18 = arith.constant 0 : index
    %c0_19 = arith.constant 0 : index
    %41 = vector.load %arg11[%c0_18, %c0_19] : memref<6x4xf32, #tpu.memory_space<vmem>>, vector<1x4xf32>
    %42 = arith.minimumf %41, %33 : vector<1x4xf32>
    %c0_20 = arith.constant 0 : index
    %c0_21 = arith.constant 0 : index
    %43 = vector.load %arg11[%c0_20, %c0_21] : memref<6x4xf32, #tpu.memory_space<vmem>>, vector<1x4xf32>
    tpu.vector_store %arg11[%c0_20, %c0_21], %42 {strides = array<i32>} : memref<6x4xf32, #tpu.memory_space<vmem>>, vector<1x4xf32>,
    %c0_22 = arith.constant 0 : index
    %c0_23 = arith.constant 0 : index
    %44 = vector.load %arg12[%c0_22, %c0_23] : memref<6x4xf32, #tpu.memory_space<vmem>>, vector<1x4xf32>
    %45 = arith.maximumf %44, %40 : vector<1x4xf32>
    %c0_24 = arith.constant 0 : index
    %c0_25 = arith.constant 0 : index
    %46 = vector.load %arg12[%c0_24, %c0_25] : memref<6x4xf32, #tpu.memory_space<vmem>>, vector<1x4xf32>
    tpu.vector_store %arg12[%c0_24, %c0_25], %45 {strides = array<i32>} : memref<6x4xf32, #tpu.memory_space<vmem>>, vector<1x4xf32>,
    %47 = vector.extract_strided_slice %7 {offsets = [0, 1, 0], sizes = [2, 1, 128], strides = [1, 1, 1]} : vector<2x6x128xi1> to vector<2x1x128xi1>
    %cst_26 = arith.constant 0x7F800000 : f32
    %48 = vector.shape_cast %47 : vector<2x1x128xi1> to vector<2x1x128xi1>
    %49 = vector.broadcast %48 : vector<2x1x128xi1> to vector<2x4x128xi1>
    %50 = vector.broadcast %cst_26 : f32 to vector<2x4x128xf32>
    %51 = arith.select %49, %3, %50 : vector<2x4x128xi1>, vector<2x4x128xf32>
    %cst_27 = arith.constant dense<0x7F800000> : vector<2x4xf32>
    %52 = vector.multi_reduction <minimumf>, %51, %cst_27 [2] : vector<2x4x128xf32> to vector<2x4xf32>
    %cst_28 = arith.constant dense<0x7F800000> : vector<4xf32>
    %53 = vector.multi_reduction <minimumf>, %52, %cst_28 [0] : vector<2x4xf32> to vector<4xf32>
    %54 = vector.shape_cast %53 : vector<4xf32> to vector<1x4xf32>
    %cst_29 = arith.constant 0xFF800000 : f32
    %55 = vector.shape_cast %47 : vector<2x1x128xi1> to vector<2x1x128xi1>
    %56 = vector.broadcast %55 : vector<2x1x128xi1> to vector<2x4x128xi1>
    %57 = vector.broadcast %cst_29 : f32 to vector<2x4x128xf32>
    %58 = arith.select %56, %3, %57 : vector<2x4x128xi1>, vector<2x4x128xf32>
    %cst_30 = arith.constant dense<0xFF800000> : vector<2x4xf32>
    %59 = vector.multi_reduction <maximumf>, %58, %cst_30 [2] : vector<2x4x128xf32> to vector<2x4xf32>
    %cst_31 = arith.constant dense<0xFF800000> : vector<4xf32>
    %60 = vector.multi_reduction <maximumf>, %59, %cst_31 [0] : vector<2x4xf32> to vector<4xf32>
    %61 = vector.shape_cast %60 : vector<4xf32> to vector<1x4xf32>
    %c1 = arith.constant 1 : index
    %c0_32 = arith.constant 0 : index
    %62 = vector.load %arg11[%c1, %c0_32] : memref<6x4xf32, #tpu.memory_space<vmem>>, vector<1x4xf32>
    %63 = arith.minimumf %62, %54 : vector<1x4xf32>
    %c1_33 = arith.constant 1 : index
    %c0_34 = arith.constant 0 : index
    %64 = vector.load %arg11[%c1_33, %c0_34] : memref<6x4xf32, #tpu.memory_space<vmem>>, vector<1x4xf32>
    tpu.vector_store %arg11[%c1_33, %c0_34], %63 {strides = array<i32>} : memref<6x4xf32, #tpu.memory_space<vmem>>, vector<1x4xf32>,
    %c1_35 = arith.constant 1 : index
    %c0_36 = arith.constant 0 : index
    %65 = vector.load %arg12[%c1_35, %c0_36] : memref<6x4xf32, #tpu.memory_space<vmem>>, vector<1x4xf32>
    %66 = arith.maximumf %65, %61 : vector<1x4xf32>
    %c1_37 = arith.constant 1 : index
    %c0_38 = arith.constant 0 : index
    %67 = vector.load %arg12[%c1_37, %c0_38] : memref<6x4xf32, #tpu.memory_space<vmem>>, vector<1x4xf32>
    tpu.vector_store %arg12[%c1_37, %c0_38], %66 {strides = array<i32>} : memref<6x4xf32, #tpu.memory_space<vmem>>, vector<1x4xf32>,
    %68 = vector.extract_strided_slice %7 {offsets = [0, 2, 0], sizes = [2, 1, 128], strides = [1, 1, 1]} : vector<2x6x128xi1> to vector<2x1x128xi1>
    %cst_39 = arith.constant 0x7F800000 : f32
    %69 = vector.shape_cast %68 : vector<2x1x128xi1> to vector<2x1x128xi1>
    %70 = vector.broadcast %69 : vector<2x1x128xi1> to vector<2x4x128xi1>
    %71 = vector.broadcast %cst_39 : f32 to vector<2x4x128xf32>
    %72 = arith.select %70, %3, %71 : vector<2x4x128xi1>, vector<2x4x128xf32>
    %cst_40 = arith.constant dense<0x7F800000> : vector<2x4xf32>
    %73 = vector.multi_reduction <minimumf>, %72, %cst_40 [2] : vector<2x4x128xf32> to vector<2x4xf32>
    %cst_41 = arith.constant dense<0x7F800000> : vector<4xf32>
    %74 = vector.multi_reduction <minimumf>, %73, %cst_41 [0] : vector<2x4xf32> to vector<4xf32>
    %75 = vector.shape_cast %74 : vector<4xf32> to vector<1x4xf32>
    %cst_42 = arith.constant 0xFF800000 : f32
    %76 = vector.shape_cast %68 : vector<2x1x128xi1> to vector<2x1x128xi1>
    %77 = vector.broadcast %76 : vector<2x1x128xi1> to vector<2x4x128xi1>
    %78 = vector.broadcast %cst_42 : f32 to vector<2x4x128xf32>
    %79 = arith.select %77, %3, %78 : vector<2x4x128xi1>, vector<2x4x128xf32>
    %cst_43 = arith.constant dense<0xFF800000> : vector<2x4xf32>
    %80 = vector.multi_reduction <maximumf>, %79, %cst_43 [2] : vector<2x4x128xf32> to vector<2x4xf32>
    %cst_44 = arith.constant dense<0xFF800000> : vector<4xf32>
    %81 = vector.multi_reduction <maximumf>, %80, %cst_44 [0] : vector<2x4xf32> to vector<4xf32>
    %82 = vector.shape_cast %81 : vector<4xf32> to vector<1x4xf32>
    %c2 = arith.constant 2 : index
    %c0_45 = arith.constant 0 : index
    %83 = vector.load %arg11[%c2, %c0_45] : memref<6x4xf32, #tpu.memory_space<vmem>>, vector<1x4xf32>
    %84 = arith.minimumf %83, %75 : vector<1x4xf32>
    %c2_46 = arith.constant 2 : index
    %c0_47 = arith.constant 0 : index
    %85 = vector.load %arg11[%c2_46, %c0_47] : memref<6x4xf32, #tpu.memory_space<vmem>>, vector<1x4xf32>
    tpu.vector_store %arg11[%c2_46, %c0_47], %84 {strides = array<i32>} : memref<6x4xf32, #tpu.memory_space<vmem>>, vector<1x4xf32>,
    %c2_48 = arith.constant 2 : index
    %c0_49 = arith.constant 0 : index
    %86 = vector.load %arg12[%c2_48, %c0_49] : memref<6x4xf32, #tpu.memory_space<vmem>>, vector<1x4xf32>
    %87 = arith.maximumf %86, %82 : vector<1x4xf32>
    %c2_50 = arith.constant 2 : index
    %c0_51 = arith.constant 0 : index
    %88 = vector.load %arg12[%c2_50, %c0_51] : memref<6x4xf32, #tpu.memory_space<vmem>>, vector<1x4xf32>
    tpu.vector_store %arg12[%c2_50, %c0_51], %87 {strides = array<i32>} : memref<6x4xf32, #tpu.memory_space<vmem>>, vector<1x4xf32>,
    %89 = vector.extract_strided_slice %7 {offsets = [0, 3, 0], sizes = [2, 1, 128], strides = [1, 1, 1]} : vector<2x6x128xi1> to vector<2x1x128xi1>
    %cst_52 = arith.constant 0x7F800000 : f32
    %90 = vector.shape_cast %89 : vector<2x1x128xi1> to vector<2x1x128xi1>
    %91 = vector.broadcast %90 : vector<2x1x128xi1> to vector<2x4x128xi1>
    %92 = vector.broadcast %cst_52 : f32 to vector<2x4x128xf32>
    %93 = arith.select %91, %3, %92 : vector<2x4x128xi1>, vector<2x4x128xf32>
    %cst_53 = arith.constant dense<0x7F800000> : vector<2x4xf32>
    %94 = vector.multi_reduction <minimumf>, %93, %cst_53 [2] : vector<2x4x128xf32> to vector<2x4xf32>
    %cst_54 = arith.constant dense<0x7F800000> : vector<4xf32>
    %95 = vector.multi_reduction <minimumf>, %94, %cst_54 [0] : vector<2x4xf32> to vector<4xf32>
    %96 = vector.shape_cast %95 : vector<4xf32> to vector<1x4xf32>
    %cst_55 = arith.constant 0xFF800000 : f32
    %97 = vector.shape_cast %89 : vector<2x1x128xi1> to vector<2x1x128xi1>
    %98 = vector.broadcast %97 : vector<2x1x128xi1> to vector<2x4x128xi1>
    %99 = vector.broadcast %cst_55 : f32 to vector<2x4x128xf32>
    %100 = arith.select %98, %3, %99 : vector<2x4x128xi1>, vector<2x4x128xf32>
    %cst_56 = arith.constant dense<0xFF800000> : vector<2x4xf32>
    %101 = vector.multi_reduction <maximumf>, %100, %cst_56 [2] : vector<2x4x128xf32> to vector<2x4xf32>
    %cst_57 = arith.constant dense<0xFF800000> : vector<4xf32>
    %102 = vector.multi_reduction <maximumf>, %101, %cst_57 [0] : vector<2x4xf32> to vector<4xf32>
    %103 = vector.shape_cast %102 : vector<4xf32> to vector<1x4xf32>
    %c3 = arith.constant 3 : index
    %c0_58 = arith.constant 0 : index
    %104 = vector.load %arg11[%c3, %c0_58] : memref<6x4xf32, #tpu.memory_space<vmem>>, vector<1x4xf32>
    %105 = arith.minimumf %104, %96 : vector<1x4xf32>
    %c3_59 = arith.constant 3 : index
    %c0_60 = arith.constant 0 : index
    %106 = vector.load %arg11[%c3_59, %c0_60] : memref<6x4xf32, #tpu.memory_space<vmem>>, vector<1x4xf32>
    tpu.vector_store %arg11[%c3_59, %c0_60], %105 {strides = array<i32>} : memref<6x4xf32, #tpu.memory_space<vmem>>, vector<1x4xf32>,
    %c3_61 = arith.constant 3 : index
    %c0_62 = arith.constant 0 : index
    %107 = vector.load %arg12[%c3_61, %c0_62] : memref<6x4xf32, #tpu.memory_space<vmem>>, vector<1x4xf32>
    %108 = arith.maximumf %107, %103 : vector<1x4xf32>
    %c3_63 = arith.constant 3 : index
    %c0_64 = arith.constant 0 : index
    %109 = vector.load %arg12[%c3_63, %c0_64] : memref<6x4xf32, #tpu.memory_space<vmem>>, vector<1x4xf32>
    tpu.vector_store %arg12[%c3_63, %c0_64], %108 {strides = array<i32>} : memref<6x4xf32, #tpu.memory_space<vmem>>, vector<1x4xf32>,
    %110 = vector.extract_strided_slice %7 {offsets = [0, 4, 0], sizes = [2, 1, 128], strides = [1, 1, 1]} : vector<2x6x128xi1> to vector<2x1x128xi1>
    %cst_65 = arith.constant 0x7F800000 : f32
    %111 = vector.shape_cast %110 : vector<2x1x128xi1> to vector<2x1x128xi1>
    %112 = vector.broadcast %111 : vector<2x1x128xi1> to vector<2x4x128xi1>
    %113 = vector.broadcast %cst_65 : f32 to vector<2x4x128xf32>
    %114 = arith.select %112, %3, %113 : vector<2x4x128xi1>, vector<2x4x128xf32>
    %cst_66 = arith.constant dense<0x7F800000> : vector<2x4xf32>
    %115 = vector.multi_reduction <minimumf>, %114, %cst_66 [2] : vector<2x4x128xf32> to vector<2x4xf32>
    %cst_67 = arith.constant dense<0x7F800000> : vector<4xf32>
    %116 = vector.multi_reduction <minimumf>, %115, %cst_67 [0] : vector<2x4xf32> to vector<4xf32>
    %117 = vector.shape_cast %116 : vector<4xf32> to vector<1x4xf32>
    %cst_68 = arith.constant 0xFF800000 : f32
    %118 = vector.shape_cast %110 : vector<2x1x128xi1> to vector<2x1x128xi1>
    %119 = vector.broadcast %118 : vector<2x1x128xi1> to vector<2x4x128xi1>
    %120 = vector.broadcast %cst_68 : f32 to vector<2x4x128xf32>
    %121 = arith.select %119, %3, %120 : vector<2x4x128xi1>, vector<2x4x128xf32>
    %cst_69 = arith.constant dense<0xFF800000> : vector<2x4xf32>
    %122 = vector.multi_reduction <maximumf>, %121, %cst_69 [2] : vector<2x4x128xf32> to vector<2x4xf32>
    %cst_70 = arith.constant dense<0xFF800000> : vector<4xf32>
    %123 = vector.multi_reduction <maximumf>, %122, %cst_70 [0] : vector<2x4xf32> to vector<4xf32>
    %124 = vector.shape_cast %123 : vector<4xf32> to vector<1x4xf32>
    %c4 = arith.constant 4 : index
    %c0_71 = arith.constant 0 : index
    %125 = vector.load %arg11[%c4, %c0_71] : memref<6x4xf32, #tpu.memory_space<vmem>>, vector<1x4xf32>
    %126 = arith.minimumf %125, %117 : vector<1x4xf32>
    %c4_72 = arith.constant 4 : index
    %c0_73 = arith.constant 0 : index
    %127 = vector.load %arg11[%c4_72, %c0_73] : memref<6x4xf32, #tpu.memory_space<vmem>>, vector<1x4xf32>
    tpu.vector_store %arg11[%c4_72, %c0_73], %126 {strides = array<i32>} : memref<6x4xf32, #tpu.memory_space<vmem>>, vector<1x4xf32>,
    %c4_74 = arith.constant 4 : index
    %c0_75 = arith.constant 0 : index
    %128 = vector.load %arg12[%c4_74, %c0_75] : memref<6x4xf32, #tpu.memory_space<vmem>>, vector<1x4xf32>
    %129 = arith.maximumf %128, %124 : vector<1x4xf32>
    %c4_76 = arith.constant 4 : index
    %c0_77 = arith.constant 0 : index
    %130 = vector.load %arg12[%c4_76, %c0_77] : memref<6x4xf32, #tpu.memory_space<vmem>>, vector<1x4xf32>
    tpu.vector_store %arg12[%c4_76, %c0_77], %129 {strides = array<i32>} : memref<6x4xf32, #tpu.memory_space<vmem>>, vector<1x4xf32>,
    %131 = vector.extract_strided_slice %7 {offsets = [0, 5, 0], sizes = [2, 1, 128], strides = [1, 1, 1]} : vector<2x6x128xi1> to vector<2x1x128xi1>
    %cst_78 = arith.constant 0x7F800000 : f32
    %132 = vector.shape_cast %131 : vector<2x1x128xi1> to vector<2x1x128xi1>
    %133 = vector.broadcast %132 : vector<2x1x128xi1> to vector<2x4x128xi1>
    %134 = vector.broadcast %cst_78 : f32 to vector<2x4x128xf32>
    %135 = arith.select %133, %3, %134 : vector<2x4x128xi1>, vector<2x4x128xf32>
    %cst_79 = arith.constant dense<0x7F800000> : vector<2x4xf32>
    %136 = vector.multi_reduction <minimumf>, %135, %cst_79 [2] : vector<2x4x128xf32> to vector<2x4xf32>
    %cst_80 = arith.constant dense<0x7F800000> : vector<4xf32>
    %137 = vector.multi_reduction <minimumf>, %136, %cst_80 [0] : vector<2x4xf32> to vector<4xf32>
    %138 = vector.shape_cast %137 : vector<4xf32> to vector<1x4xf32>
    %cst_81 = arith.constant 0xFF800000 : f32
    %139 = vector.shape_cast %131 : vector<2x1x128xi1> to vector<2x1x128xi1>
    %140 = vector.broadcast %139 : vector<2x1x128xi1> to vector<2x4x128xi1>
    %141 = vector.broadcast %cst_81 : f32 to vector<2x4x128xf32>
    %142 = arith.select %140, %3, %141 : vector<2x4x128xi1>, vector<2x4x128xf32>
    %cst_82 = arith.constant dense<0xFF800000> : vector<2x4xf32>
    %143 = vector.multi_reduction <maximumf>, %142, %cst_82 [2] : vector<2x4x128xf32> to vector<2x4xf32>
    %cst_83 = arith.constant dense<0xFF800000> : vector<4xf32>
    %144 = vector.multi_reduction <maximumf>, %143, %cst_83 [0] : vector<2x4xf32> to vector<4xf32>
    %145 = vector.shape_cast %144 : vector<4xf32> to vector<1x4xf32>
    %c5 = arith.constant 5 : index
    %c0_84 = arith.constant 0 : index
    %146 = vector.load %arg11[%c5, %c0_84] : memref<6x4xf32, #tpu.memory_space<vmem>>, vector<1x4xf32>
    %147 = arith.minimumf %146, %138 : vector<1x4xf32>
    %c5_85 = arith.constant 5 : index
    %c0_86 = arith.constant 0 : index
    %148 = vector.load %arg11[%c5_85, %c0_86] : memref<6x4xf32, #tpu.memory_space<vmem>>, vector<1x4xf32>
    tpu.vector_store %arg11[%c5_85, %c0_86], %147 {strides = array<i32>} : memref<6x4xf32, #tpu.memory_space<vmem>>, vector<1x4xf32>,
    %c5_87 = arith.constant 5 : index
    %c0_88 = arith.constant 0 : index
    %149 = vector.load %arg12[%c5_87, %c0_88] : memref<6x4xf32, #tpu.memory_space<vmem>>, vector<1x4xf32>
    %150 = arith.maximumf %149, %145 : vector<1x4xf32>
    %c5_89 = arith.constant 5 : index
    %c0_90 = arith.constant 0 : index
    %151 = vector.load %arg12[%c5_89, %c0_90] : memref<6x4xf32, #tpu.memory_space<vmem>>, vector<1x4xf32>
    tpu.vector_store %arg12[%c5_89, %c0_90], %150 {strides = array<i32>} : memref<6x4xf32, #tpu.memory_space<vmem>>, vector<1x4xf32>,
    %c0_91 = arith.constant 0 : index
    %c0_92 = arith.constant 0 : index
    %c0_93 = arith.constant 0 : index
    %152 = vector.load %arg3[%c0_91, %c0_92, %c0_93] : memref<2x1x128xi32, #tpu.memory_space<vmem>>, vector<2x1x128xi32>
    %153 = tpu.iota {dimensions = array<i32: 1>} : vector<2x5x128xi32>
    %154 = vector.broadcast %152 : vector<2x1x128xi32> to vector<2x5x128xi32>
    %155 = arith.cmpi eq, %154, %153 : vector<2x5x128xi32>
    %156 = arith.extui %155 : vector<2x5x128xi1> to vector<2x5x128xi32>
    %157 = arith.sitofp %156 : vector<2x5x128xi32> to vector<2x5x128xf32>
    %cst_94 = arith.constant 0.000000e+00 : f32
    %158 = vector.broadcast %cst_94 : f32 to vector<5x4xf32>
    %159 = vector.extract_strided_slice %157 {offsets = [0, 0, 0], sizes = [1, 5, 128], strides = [1, 1, 1]} : vector<2x5x128xf32> to vector<1x5x128xf32>
    %160 = vector.shape_cast %159 : vector<1x5x128xf32> to vector<5x128xf32>
    %161 = vector.extract_strided_slice %3 {offsets = [0, 0, 0], sizes = [1, 4, 128], strides = [1, 1, 1]} : vector<2x4x128xf32> to vector<1x4x128xf32>
    %162 = vector.shape_cast %161 : vector<1x4x128xf32> to vector<4x128xf32>
    %cst_95 = arith.constant dense<0.000000e+00> : vector<5x4xf32>
    %163 = tpu.matmul %160, %162, %cst_95 {dimension_numbers = #tpu.dot_dimension_numbers<[1], [1], [0], [0], [0, 0, 1, 0], [], []>} : vector<5x128xf32>, vector<4x128xf32>, vector<5x4xf32> -> vector<5x4xf32>
    %164 = arith.addf %158, %163 : vector<5x4xf32>
    %165 = vector.extract_strided_slice %157 {offsets = [1, 0, 0], sizes = [1, 5, 128], strides = [1, 1, 1]} : vector<2x5x128xf32> to vector<1x5x128xf32>
    %166 = vector.shape_cast %165 : vector<1x5x128xf32> to vector<5x128xf32>
    %167 = vector.extract_strided_slice %3 {offsets = [1, 0, 0], sizes = [1, 4, 128], strides = [1, 1, 1]} : vector<2x4x128xf32> to vector<1x4x128xf32>
    %168 = vector.shape_cast %167 : vector<1x4x128xf32> to vector<4x128xf32>
    %cst_96 = arith.constant dense<0.000000e+00> : vector<5x4xf32>
    %169 = tpu.matmul %166, %168, %cst_96 {dimension_numbers = #tpu.dot_dimension_numbers<[1], [1], [0], [0], [0, 0, 1, 0], [], []>} : vector<5x128xf32>, vector<4x128xf32>, vector<5x4xf32> -> vector<5x4xf32>
    %170 = arith.addf %164, %169 : vector<5x4xf32>
    %c0_97 = arith.constant 0 : index
    %c0_98 = arith.constant 0 : index
    %171 = vector.load %arg13[%c0_97, %c0_98] : memref<5x4xf32, #tpu.memory_space<vmem>>, vector<5x4xf32>
    %172 = arith.addf %171, %170 : vector<5x4xf32>
    %c0_99 = arith.constant 0 : index
    %c0_100 = arith.constant 0 : index
    %173 = vector.load %arg13[%c0_99, %c0_100] : memref<5x4xf32, #tpu.memory_space<vmem>>, vector<5x4xf32>
    tpu.vector_store %arg13[%c0_99, %c0_100], %172 {strides = array<i32>} : memref<5x4xf32, #tpu.memory_space<vmem>>, vector<5x4xf32>,
    %174 = vector.extract_strided_slice %155 {offsets = [0, 0, 0], sizes = [2, 1, 128], strides = [1, 1, 1]} : vector<2x5x128xi1> to vector<2x1x128xi1>
    %cst_101 = arith.constant 0x7F800000 : f32
    %175 = vector.shape_cast %174 : vector<2x1x128xi1> to vector<2x1x128xi1>
    %176 = vector.broadcast %175 : vector<2x1x128xi1> to vector<2x4x128xi1>
    %177 = vector.broadcast %cst_101 : f32 to vector<2x4x128xf32>
    %178 = arith.select %176, %3, %177 : vector<2x4x128xi1>, vector<2x4x128xf32>
    %cst_102 = arith.constant dense<0x7F800000> : vector<2x4xf32>
    %179 = vector.multi_reduction <minimumf>, %178, %cst_102 [2] : vector<2x4x128xf32> to vector<2x4xf32>
    %cst_103 = arith.constant dense<0x7F800000> : vector<4xf32>
    %180 = vector.multi_reduction <minimumf>, %179, %cst_103 [0] : vector<2x4xf32> to vector<4xf32>
    %181 = vector.shape_cast %180 : vector<4xf32> to vector<1x4xf32>
    %cst_104 = arith.constant 0xFF800000 : f32
    %182 = vector.shape_cast %174 : vector<2x1x128xi1> to vector<2x1x128xi1>
    %183 = vector.broadcast %182 : vector<2x1x128xi1> to vector<2x4x128xi1>
    %184 = vector.broadcast %cst_104 : f32 to vector<2x4x128xf32>
    %185 = arith.select %183, %3, %184 : vector<2x4x128xi1>, vector<2x4x128xf32>
    %cst_105 = arith.constant dense<0xFF800000> : vector<2x4xf32>
    %186 = vector.multi_reduction <maximumf>, %185, %cst_105 [2] : vector<2x4x128xf32> to vector<2x4xf32>
    %cst_106 = arith.constant dense<0xFF800000> : vector<4xf32>
    %187 = vector.multi_reduction <maximumf>, %186, %cst_106 [0] : vector<2x4xf32> to vector<4xf32>
    %188 = vector.shape_cast %187 : vector<4xf32> to vector<1x4xf32>
    %c0_107 = arith.constant 0 : index
    %c0_108 = arith.constant 0 : index
    %189 = vector.load %arg14[%c0_107, %c0_108] : memref<5x4xf32, #tpu.memory_space<vmem>>, vector<1x4xf32>
    %190 = arith.minimumf %189, %181 : vector<1x4xf32>
    %c0_109 = arith.constant 0 : index
    %c0_110 = arith.constant 0 : index
    %191 = vector.load %arg14[%c0_109, %c0_110] : memref<5x4xf32, #tpu.memory_space<vmem>>, vector<1x4xf32>
    tpu.vector_store %arg14[%c0_109, %c0_110], %190 {strides = array<i32>} : memref<5x4xf32, #tpu.memory_space<vmem>>, vector<1x4xf32>,
    %c0_111 = arith.constant 0 : index
    %c0_112 = arith.constant 0 : index
    %192 = vector.load %arg15[%c0_111, %c0_112] : memref<5x4xf32, #tpu.memory_space<vmem>>, vector<1x4xf32>
    %193 = arith.maximumf %192, %188 : vector<1x4xf32>
    %c0_113 = arith.constant 0 : index
    %c0_114 = arith.constant 0 : index
    %194 = vector.load %arg15[%c0_113, %c0_114] : memref<5x4xf32, #tpu.memory_space<vmem>>, vector<1x4xf32>
    tpu.vector_store %arg15[%c0_113, %c0_114], %193 {strides = array<i32>} : memref<5x4xf32, #tpu.memory_space<vmem>>, vector<1x4xf32>,
    %195 = vector.extract_strided_slice %155 {offsets = [0, 1, 0], sizes = [2, 1, 128], strides = [1, 1, 1]} : vector<2x5x128xi1> to vector<2x1x128xi1>
    %cst_115 = arith.constant 0x7F800000 : f32
    %196 = vector.shape_cast %195 : vector<2x1x128xi1> to vector<2x1x128xi1>
    %197 = vector.broadcast %196 : vector<2x1x128xi1> to vector<2x4x128xi1>
    %198 = vector.broadcast %cst_115 : f32 to vector<2x4x128xf32>
    %199 = arith.select %197, %3, %198 : vector<2x4x128xi1>, vector<2x4x128xf32>
    %cst_116 = arith.constant dense<0x7F800000> : vector<2x4xf32>
    %200 = vector.multi_reduction <minimumf>, %199, %cst_116 [2] : vector<2x4x128xf32> to vector<2x4xf32>
    %cst_117 = arith.constant dense<0x7F800000> : vector<4xf32>
    %201 = vector.multi_reduction <minimumf>, %200, %cst_117 [0] : vector<2x4xf32> to vector<4xf32>
    %202 = vector.shape_cast %201 : vector<4xf32> to vector<1x4xf32>
    %cst_118 = arith.constant 0xFF800000 : f32
    %203 = vector.shape_cast %195 : vector<2x1x128xi1> to vector<2x1x128xi1>
    %204 = vector.broadcast %203 : vector<2x1x128xi1> to vector<2x4x128xi1>
    %205 = vector.broadcast %cst_118 : f32 to vector<2x4x128xf32>
    %206 = arith.select %204, %3, %205 : vector<2x4x128xi1>, vector<2x4x128xf32>
    %cst_119 = arith.constant dense<0xFF800000> : vector<2x4xf32>
    %207 = vector.multi_reduction <maximumf>, %206, %cst_119 [2] : vector<2x4x128xf32> to vector<2x4xf32>
    %cst_120 = arith.constant dense<0xFF800000> : vector<4xf32>
    %208 = vector.multi_reduction <maximumf>, %207, %cst_120 [0] : vector<2x4xf32> to vector<4xf32>
    %209 = vector.shape_cast %208 : vector<4xf32> to vector<1x4xf32>
    %c1_121 = arith.constant 1 : index
    %c0_122 = arith.constant 0 : index
    %210 = vector.load %arg14[%c1_121, %c0_122] : memref<5x4xf32, #tpu.memory_space<vmem>>, vector<1x4xf32>
    %211 = arith.minimumf %210, %202 : vector<1x4xf32>
    %c1_123 = arith.constant 1 : index
    %c0_124 = arith.constant 0 : index
    %212 = vector.load %arg14[%c1_123, %c0_124] : memref<5x4xf32, #tpu.memory_space<vmem>>, vector<1x4xf32>
    tpu.vector_store %arg14[%c1_123, %c0_124], %211 {strides = array<i32>} : memref<5x4xf32, #tpu.memory_space<vmem>>, vector<1x4xf32>,
    %c1_125 = arith.constant 1 : index
    %c0_126 = arith.constant 0 : index
    %213 = vector.load %arg15[%c1_125, %c0_126] : memref<5x4xf32, #tpu.memory_space<vmem>>, vector<1x4xf32>
    %214 = arith.maximumf %213, %209 : vector<1x4xf32>
    %c1_127 = arith.constant 1 : index
    %c0_128 = arith.constant 0 : index
    %215 = vector.load %arg15[%c1_127, %c0_128] : memref<5x4xf32, #tpu.memory_space<vmem>>, vector<1x4xf32>
    tpu.vector_store %arg15[%c1_127, %c0_128], %214 {strides = array<i32>} : memref<5x4xf32, #tpu.memory_space<vmem>>, vector<1x4xf32>,
    %216 = vector.extract_strided_slice %155 {offsets = [0, 2, 0], sizes = [2, 1, 128], strides = [1, 1, 1]} : vector<2x5x128xi1> to vector<2x1x128xi1>
    %cst_129 = arith.constant 0x7F800000 : f32
    %217 = vector.shape_cast %216 : vector<2x1x128xi1> to vector<2x1x128xi1>
    %218 = vector.broadcast %217 : vector<2x1x128xi1> to vector<2x4x128xi1>
    %219 = vector.broadcast %cst_129 : f32 to vector<2x4x128xf32>
    %220 = arith.select %218, %3, %219 : vector<2x4x128xi1>, vector<2x4x128xf32>
    %cst_130 = arith.constant dense<0x7F800000> : vector<2x4xf32>
    %221 = vector.multi_reduction <minimumf>, %220, %cst_130 [2] : vector<2x4x128xf32> to vector<2x4xf32>
    %cst_131 = arith.constant dense<0x7F800000> : vector<4xf32>
    %222 = vector.multi_reduction <minimumf>, %221, %cst_131 [0] : vector<2x4xf32> to vector<4xf32>
    %223 = vector.shape_cast %222 : vector<4xf32> to vector<1x4xf32>
    %cst_132 = arith.constant 0xFF800000 : f32
    %224 = vector.shape_cast %216 : vector<2x1x128xi1> to vector<2x1x128xi1>
    %225 = vector.broadcast %224 : vector<2x1x128xi1> to vector<2x4x128xi1>
    %226 = vector.broadcast %cst_132 : f32 to vector<2x4x128xf32>
    %227 = arith.select %225, %3, %226 : vector<2x4x128xi1>, vector<2x4x128xf32>
    %cst_133 = arith.constant dense<0xFF800000> : vector<2x4xf32>
    %228 = vector.multi_reduction <maximumf>, %227, %cst_133 [2] : vector<2x4x128xf32> to vector<2x4xf32>
    %cst_134 = arith.constant dense<0xFF800000> : vector<4xf32>
    %229 = vector.multi_reduction <maximumf>, %228, %cst_134 [0] : vector<2x4xf32> to vector<4xf32>
    %230 = vector.shape_cast %229 : vector<4xf32> to vector<1x4xf32>
    %c2_135 = arith.constant 2 : index
    %c0_136 = arith.constant 0 : index
    %231 = vector.load %arg14[%c2_135, %c0_136] : memref<5x4xf32, #tpu.memory_space<vmem>>, vector<1x4xf32>
    %232 = arith.minimumf %231, %223 : vector<1x4xf32>
    %c2_137 = arith.constant 2 : index
    %c0_138 = arith.constant 0 : index
    %233 = vector.load %arg14[%c2_137, %c0_138] : memref<5x4xf32, #tpu.memory_space<vmem>>, vector<1x4xf32>
    tpu.vector_store %arg14[%c2_137, %c0_138], %232 {strides = array<i32>} : memref<5x4xf32, #tpu.memory_space<vmem>>, vector<1x4xf32>,
    %c2_139 = arith.constant 2 : index
    %c0_140 = arith.constant 0 : index
    %234 = vector.load %arg15[%c2_139, %c0_140] : memref<5x4xf32, #tpu.memory_space<vmem>>, vector<1x4xf32>
    %235 = arith.maximumf %234, %230 : vector<1x4xf32>
    %c2_141 = arith.constant 2 : index
    %c0_142 = arith.constant 0 : index
    %236 = vector.load %arg15[%c2_141, %c0_142] : memref<5x4xf32, #tpu.memory_space<vmem>>, vector<1x4xf32>
    tpu.vector_store %arg15[%c2_141, %c0_142], %235 {strides = array<i32>} : memref<5x4xf32, #tpu.memory_space<vmem>>, vector<1x4xf32>,
    %237 = vector.extract_strided_slice %155 {offsets = [0, 3, 0], sizes = [2, 1, 128], strides = [1, 1, 1]} : vector<2x5x128xi1> to vector<2x1x128xi1>
    %cst_143 = arith.constant 0x7F800000 : f32
    %238 = vector.shape_cast %237 : vector<2x1x128xi1> to vector<2x1x128xi1>
    %239 = vector.broadcast %238 : vector<2x1x128xi1> to vector<2x4x128xi1>
    %240 = vector.broadcast %cst_143 : f32 to vector<2x4x128xf32>
    %241 = arith.select %239, %3, %240 : vector<2x4x128xi1>, vector<2x4x128xf32>
    %cst_144 = arith.constant dense<0x7F800000> : vector<2x4xf32>
    %242 = vector.multi_reduction <minimumf>, %241, %cst_144 [2] : vector<2x4x128xf32> to vector<2x4xf32>
    %cst_145 = arith.constant dense<0x7F800000> : vector<4xf32>
    %243 = vector.multi_reduction <minimumf>, %242, %cst_145 [0] : vector<2x4xf32> to vector<4xf32>
    %244 = vector.shape_cast %243 : vector<4xf32> to vector<1x4xf32>
    %cst_146 = arith.constant 0xFF800000 : f32
    %245 = vector.shape_cast %237 : vector<2x1x128xi1> to vector<2x1x128xi1>
    %246 = vector.broadcast %245 : vector<2x1x128xi1> to vector<2x4x128xi1>
    %247 = vector.broadcast %cst_146 : f32 to vector<2x4x128xf32>
    %248 = arith.select %246, %3, %247 : vector<2x4x128xi1>, vector<2x4x128xf32>
    %cst_147 = arith.constant dense<0xFF800000> : vector<2x4xf32>
    %249 = vector.multi_reduction <maximumf>, %248, %cst_147 [2] : vector<2x4x128xf32> to vector<2x4xf32>
    %cst_148 = arith.constant dense<0xFF800000> : vector<4xf32>
    %250 = vector.multi_reduction <maximumf>, %249, %cst_148 [0] : vector<2x4xf32> to vector<4xf32>
    %251 = vector.shape_cast %250 : vector<4xf32> to vector<1x4xf32>
    %c3_149 = arith.constant 3 : index
    %c0_150 = arith.constant 0 : index
    %252 = vector.load %arg14[%c3_149, %c0_150] : memref<5x4xf32, #tpu.memory_space<vmem>>, vector<1x4xf32>
    %253 = arith.minimumf %252, %244 : vector<1x4xf32>
    %c3_151 = arith.constant 3 : index
    %c0_152 = arith.constant 0 : index
    %254 = vector.load %arg14[%c3_151, %c0_152] : memref<5x4xf32, #tpu.memory_space<vmem>>, vector<1x4xf32>
    tpu.vector_store %arg14[%c3_151, %c0_152], %253 {strides = array<i32>} : memref<5x4xf32, #tpu.memory_space<vmem>>, vector<1x4xf32>,
    %c3_153 = arith.constant 3 : index
    %c0_154 = arith.constant 0 : index
    %255 = vector.load %arg15[%c3_153, %c0_154] : memref<5x4xf32, #tpu.memory_space<vmem>>, vector<1x4xf32>
    %256 = arith.maximumf %255, %251 : vector<1x4xf32>
    %c3_155 = arith.constant 3 : index
    %c0_156 = arith.constant 0 : index
    %257 = vector.load %arg15[%c3_155, %c0_156] : memref<5x4xf32, #tpu.memory_space<vmem>>, vector<1x4xf32>
    tpu.vector_store %arg15[%c3_155, %c0_156], %256 {strides = array<i32>} : memref<5x4xf32, #tpu.memory_space<vmem>>, vector<1x4xf32>,
    %258 = vector.extract_strided_slice %155 {offsets = [0, 4, 0], sizes = [2, 1, 128], strides = [1, 1, 1]} : vector<2x5x128xi1> to vector<2x1x128xi1>
    %cst_157 = arith.constant 0x7F800000 : f32
    %259 = vector.shape_cast %258 : vector<2x1x128xi1> to vector<2x1x128xi1>
    %260 = vector.broadcast %259 : vector<2x1x128xi1> to vector<2x4x128xi1>
    %261 = vector.broadcast %cst_157 : f32 to vector<2x4x128xf32>
    %262 = arith.select %260, %3, %261 : vector<2x4x128xi1>, vector<2x4x128xf32>
    %cst_158 = arith.constant dense<0x7F800000> : vector<2x4xf32>
    %263 = vector.multi_reduction <minimumf>, %262, %cst_158 [2] : vector<2x4x128xf32> to vector<2x4xf32>
    %cst_159 = arith.constant dense<0x7F800000> : vector<4xf32>
    %264 = vector.multi_reduction <minimumf>, %263, %cst_159 [0] : vector<2x4xf32> to vector<4xf32>
    %265 = vector.shape_cast %264 : vector<4xf32> to vector<1x4xf32>
    %cst_160 = arith.constant 0xFF800000 : f32
    %266 = vector.shape_cast %258 : vector<2x1x128xi1> to vector<2x1x128xi1>
    %267 = vector.broadcast %266 : vector<2x1x128xi1> to vector<2x4x128xi1>
    %268 = vector.broadcast %cst_160 : f32 to vector<2x4x128xf32>
    %269 = arith.select %267, %3, %268 : vector<2x4x128xi1>, vector<2x4x128xf32>
    %cst_161 = arith.constant dense<0xFF800000> : vector<2x4xf32>
    %270 = vector.multi_reduction <maximumf>, %269, %cst_161 [2] : vector<2x4x128xf32> to vector<2x4xf32>
    %cst_162 = arith.constant dense<0xFF800000> : vector<4xf32>
    %271 = vector.multi_reduction <maximumf>, %270, %cst_162 [0] : vector<2x4xf32> to vector<4xf32>
    %272 = vector.shape_cast %271 : vector<4xf32> to vector<1x4xf32>
    %c4_163 = arith.constant 4 : index
    %c0_164 = arith.constant 0 : index
    %273 = vector.load %arg14[%c4_163, %c0_164] : memref<5x4xf32, #tpu.memory_space<vmem>>, vector<1x4xf32>
    %274 = arith.minimumf %273, %265 : vector<1x4xf32>
    %c4_165 = arith.constant 4 : index
    %c0_166 = arith.constant 0 : index
    %275 = vector.load %arg14[%c4_165, %c0_166] : memref<5x4xf32, #tpu.memory_space<vmem>>, vector<1x4xf32>
    tpu.vector_store %arg14[%c4_165, %c0_166], %274 {strides = array<i32>} : memref<5x4xf32, #tpu.memory_space<vmem>>, vector<1x4xf32>,
    %c4_167 = arith.constant 4 : index
    %c0_168 = arith.constant 0 : index
    %276 = vector.load %arg15[%c4_167, %c0_168] : memref<5x4xf32, #tpu.memory_space<vmem>>, vector<1x4xf32>
    %277 = arith.maximumf %276, %272 : vector<1x4xf32>
    %c4_169 = arith.constant 4 : index
    %c0_170 = arith.constant 0 : index
    %278 = vector.load %arg15[%c4_169, %c0_170] : memref<5x4xf32, #tpu.memory_space<vmem>>, vector<1x4xf32>
    tpu.vector_store %arg15[%c4_169, %c0_170], %277 {strides = array<i32>} : memref<5x4xf32, #tpu.memory_space<vmem>>, vector<1x4xf32>,
    %c1_i32 = arith.constant 1 : i32
    %279 = arith.cmpi eq, %arg0, %c1_i32 : i32
    %280 = arith.extui %279 : i1 to i32
    %c0_i32_171 = arith.constant 0 : i32
    %281 = arith.cmpi ne, %280, %c0_i32_171 : i32
    scf.if %281 {
      %c0_172 = arith.constant 0 : index
      %c0_173 = arith.constant 0 : index
      %282 = vector.load %arg10[%c0_172, %c0_173] : memref<6x4xf32, #tpu.memory_space<vmem>>, vector<6x4xf32>
      %c0_174 = arith.constant 0 : index
      %c0_175 = arith.constant 0 : index
      %283 = vector.load %arg4[%c0_174, %c0_175] : memref<6x1xf32, #tpu.memory_space<vmem>>, vector<6x1xf32>
      %284 = vector.broadcast %283 : vector<6x1xf32> to vector<6x4xf32>
      %285 = arith.mulf %282, %284 : vector<6x4xf32>
      %c0_176 = arith.constant 0 : index
      %c0_177 = arith.constant 0 : index
      %286 = vector.load %arg8[%c0_176, %c0_177] : memref<6x13xf32, #tpu.memory_space<vmem>>, vector<6x4xf32>
      tpu.vector_store %arg8[%c0_176, %c0_177], %285 {strides = array<i32>} : memref<6x13xf32, #tpu.memory_space<vmem>>, vector<6x4xf32>,
      %c0_178 = arith.constant 0 : index
      %c0_179 = arith.constant 0 : index
      %287 = vector.load %arg11[%c0_178, %c0_179] : memref<6x4xf32, #tpu.memory_space<vmem>>, vector<6x4xf32>
      %c0_180 = arith.constant 0 : index
      %c4_181 = arith.constant 4 : index
      %288 = vector.load %arg8[%c0_180, %c4_181] : memref<6x13xf32, #tpu.memory_space<vmem>>, vector<6x4xf32>
      tpu.vector_store %arg8[%c0_180, %c4_181], %287 {strides = array<i32>} : memref<6x13xf32, #tpu.memory_space<vmem>>, vector<6x4xf32>,
      %c0_182 = arith.constant 0 : index
      %c0_183 = arith.constant 0 : index
      %289 = vector.load %arg12[%c0_182, %c0_183] : memref<6x4xf32, #tpu.memory_space<vmem>>, vector<6x4xf32>
      %c0_184 = arith.constant 0 : index
      %c8 = arith.constant 8 : index
      %290 = vector.load %arg8[%c0_184, %c8] : memref<6x13xf32, #tpu.memory_space<vmem>>, vector<6x4xf32>
      tpu.vector_store %arg8[%c0_184, %c8], %289 {strides = array<i32>} : memref<6x13xf32, #tpu.memory_space<vmem>>, vector<6x4xf32>,
      %c0_185 = arith.constant 0 : index
      %c0_186 = arith.constant 0 : index
      %291 = vector.load %arg5[%c0_185, %c0_186] : memref<6x1xf32, #tpu.memory_space<vmem>>, vector<6x1xf32>
      %c0_187 = arith.constant 0 : index
      %c12 = arith.constant 12 : index
      %292 = vector.load %arg8[%c0_187, %c12] : memref<6x13xf32, #tpu.memory_space<vmem>>, vector<6x1xf32>
      tpu.vector_store %arg8[%c0_187, %c12], %291 {strides = array<i32>} : memref<6x13xf32, #tpu.memory_space<vmem>>, vector<6x1xf32>,
      %c0_188 = arith.constant 0 : index
      %c0_189 = arith.constant 0 : index
      %293 = vector.load %arg13[%c0_188, %c0_189] : memref<5x4xf32, #tpu.memory_space<vmem>>, vector<5x4xf32>
      %c0_190 = arith.constant 0 : index
      %c0_191 = arith.constant 0 : index
      %294 = vector.load %arg6[%c0_190, %c0_191] : memref<5x1xf32, #tpu.memory_space<vmem>>, vector<5x1xf32>
      %295 = vector.broadcast %294 : vector<5x1xf32> to vector<5x4xf32>
      %296 = arith.mulf %293, %295 : vector<5x4xf32>
      %c0_192 = arith.constant 0 : index
      %c0_193 = arith.constant 0 : index
      %297 = vector.load %arg9[%c0_192, %c0_193] : memref<5x13xf32, #tpu.memory_space<vmem>>, vector<5x4xf32>
      tpu.vector_store %arg9[%c0_192, %c0_193], %296 {strides = array<i32>} : memref<5x13xf32, #tpu.memory_space<vmem>>, vector<5x4xf32>,
      %c0_194 = arith.constant 0 : index
      %c0_195 = arith.constant 0 : index
      %298 = vector.load %arg14[%c0_194, %c0_195] : memref<5x4xf32, #tpu.memory_space<vmem>>, vector<5x4xf32>
      %c0_196 = arith.constant 0 : index
      %c4_197 = arith.constant 4 : index
      %299 = vector.load %arg9[%c0_196, %c4_197] : memref<5x13xf32, #tpu.memory_space<vmem>>, vector<5x4xf32>
      tpu.vector_store %arg9[%c0_196, %c4_197], %298 {strides = array<i32>} : memref<5x13xf32, #tpu.memory_space<vmem>>, vector<5x4xf32>,
      %c0_198 = arith.constant 0 : index
      %c0_199 = arith.constant 0 : index
      %300 = vector.load %arg15[%c0_198, %c0_199] : memref<5x4xf32, #tpu.memory_space<vmem>>, vector<5x4xf32>
      %c0_200 = arith.constant 0 : index
      %c8_201 = arith.constant 8 : index
      %301 = vector.load %arg9[%c0_200, %c8_201] : memref<5x13xf32, #tpu.memory_space<vmem>>, vector<5x4xf32>
      tpu.vector_store %arg9[%c0_200, %c8_201], %300 {strides = array<i32>} : memref<5x13xf32, #tpu.memory_space<vmem>>, vector<5x4xf32>,
      %c0_202 = arith.constant 0 : index
      %c0_203 = arith.constant 0 : index
      %302 = vector.load %arg7[%c0_202, %c0_203] : memref<5x1xf32, #tpu.memory_space<vmem>>, vector<5x1xf32>
      %c0_204 = arith.constant 0 : index
      %c12_205 = arith.constant 12 : index
      %303 = vector.load %arg9[%c0_204, %c12_205] : memref<5x13xf32, #tpu.memory_space<vmem>>, vector<5x1xf32>
      tpu.vector_store %arg9[%c0_204, %c12_205], %302 {strides = array<i32>} : memref<5x13xf32, #tpu.memory_space<vmem>>, vector<5x1xf32>,
    } else {
    }
    return
  }
  func.func @transform_0(%arg0: i32) -> (i32, i32, i32) {
    %c0_i32 = arith.constant 0 : i32
    %c0_i32_0 = arith.constant 0 : i32
    %c0_i32_1 = arith.constant 0 : i32
    return %c0_i32, %c0_i32_0, %arg0 : i32, i32, i32
  }
  func.func @transform_1(%arg0: i32) -> (i32, i32, i32) {
    %c0_i32 = arith.constant 0 : i32
    %c0_i32_0 = arith.constant 0 : i32
    %c0_i32_1 = arith.constant 0 : i32
    return %c0_i32, %c0_i32_0, %arg0 : i32, i32, i32
  }
  func.func @transform_2(%arg0: i32) -> (i32, i32, i32) {
    %c0_i32 = arith.constant 0 : i32
    %c0_i32_0 = arith.constant 0 : i32
    %c0_i32_1 = arith.constant 0 : i32
    return %c0_i32, %c0_i32_0, %arg0 : i32, i32, i32
  }
  func.func @transform_3(%arg0: i32) -> (i32, i32) {
    %c0_i32 = arith.constant 0 : i32
    %c0_i32_0 = arith.constant 0 : i32
    %c0_i32_1 = arith.constant 0 : i32
    return %c0_i32, %c0_i32_0 : i32, i32
  }
  func.func @transform_4(%arg0: i32) -> (i32, i32) {
    %c0_i32 = arith.constant 0 : i32
    %c0_i32_0 = arith.constant 0 : i32
    %c0_i32_1 = arith.constant 0 : i32
    return %c0_i32, %c0_i32_0 : i32, i32
  }
  func.func @transform_5(%arg0: i32) -> (i32, i32) {
    %c0_i32 = arith.constant 0 : i32
    %c0_i32_0 = arith.constant 0 : i32
    %c0_i32_1 = arith.constant 0 : i32
    return %c0_i32, %c0_i32_0 : i32, i32
  }
  func.func @transform_6(%arg0: i32) -> (i32, i32) {
    %c0_i32 = arith.constant 0 : i32
    %c0_i32_0 = arith.constant 0 : i32
    %c0_i32_1 = arith.constant 0 : i32
    return %c0_i32, %c0_i32_0 : i32, i32
  }
  func.func @transform_7(%arg0: i32) -> (i32, i32) {
    %c0_i32 = arith.constant 0 : i32
    %c0_i32_0 = arith.constant 0 : i32
    %c0_i32_1 = arith.constant 0 : i32
    return %c0_i32, %c0_i32_0 : i32, i32
  }
  func.func @transform_8(%arg0: i32) -> (i32, i32) {
    %c0_i32 = arith.constant 0 : i32
    %c0_i32_0 = arith.constant 0 : i32
    %c0_i32_1 = arith.constant 0 : i32
    return %c0_i32, %c0_i32_0 : i32, i32
  }
}

</mosaic_0001>

<bundles_post_ra>
// kernel: tpu_custom_call.1
= control target key start
LH: loop header
LB: loop body
LE: loop exit
PB: predicated region body
PF: predicated region fallthrough
CT: control target
= control target key end

     0   :  { %14 = vsyncpa [#allocation12], 0  ;;  %s1897_s0 = inlined_call_operand.vmem [shape: f32[2,4,256], index: 0, kind: input, shape index: {}]   ;;  %s1898_s1 = inlined_call_operand.vmem [shape: s32[2,1,256], index: 1, kind: input, shape index: {}]   ;;  %s1899_s2 = inlined_call_operand.vmem [shape: s32[2,1,256], index: 2, kind: input, shape index: {}]   ;;  %s1900_s3 = inlined_call_operand.vmem [shape: f32[6,1], index: 3, kind: input, shape index: {}]   ;;  %s1901_s4 = inlined_call_operand.vmem [shape: f32[6,1], index: 4, kind: input, shape index: {}]   ;;  %s1902_s5 = inlined_call_operand.vmem [shape: f32[5,1], index: 5, kind: input, shape index: {}]   ;;  %s1903_s6 = inlined_call_operand.vmem [shape: f32[5,1], index: 6, kind: input, shape index: {}]   ;;  %s1904_s7 = inlined_call_operand.hbm [shape: f32[6,13], index: 7, kind: output, shape index: {0}]   ;;  %s1905_s8 = inlined_call_operand.hbm [shape: f32[5,13], index: 8, kind: output, shape index: {1}]  }
   0x1   :  { %15 = vsyncpa [#allocation14], 0  ;;  %s1399_s27 = smov 0   ;;  %s1401_s28 = smov 0  }
   0x2   :  { %s1403_s29 = smov 0  }
   0x3 LB: > { %s1415_s30 = sadd.s32 4294967295, %s1341_s29   ;;  %s1418_s9 = sadd.s32 1, %s1341_s29   ;;  %s1341_s29 = sphi %s1403_s29, %s1939_s29   ;;  %s1337_s28 = sphi %s1401_s28, %s1938_s28   ;;  %s1333_s27 = sphi %s1399_s27, %s1937_s27  }
   0x4   : > { %s25_s10 = ssub.s32 %s1341_s29, %s1418_s9  ;;  %s28_s11 = sadd.s32 1, %s1337_s28 }
   0x5   : > { %p26_p0 = scmp.eq.s32.totalorder %s25_s10, 0  ;;  %p35_p1 = scmp.ne.s32.totalorder %s1337_s28, %s1333_s27 }
   0x6   : > { %p36_p2 = scmp.eq.s32.totalorder %s1341_s29, 0  ;;  %p1178_p4 = scmp.ge.s32.totalorder %s1341_s29, 2 }
   0x7   : > { %s1427_s12 = scalar_select %p26_p0, %s1337_s28, %s28_s11  }
   0x8   : > { %p1429_p3 = por %p36_p2, %p35_p1  ;;  %251 = sbr.rel (%p1178_p4) target bundleno = 29 (0x1d), region = 32 }
   0xd   : > { %254 = sbr.rel (!%p1429_p3) target bundleno = 19 (0x13), region = 36  ;;  %s256_s14 = sand.u32 (%p1429_p3), 1, %s1337_s28  }
   0xe   : > { %s1180_s15 = sshll.u32 (%p1429_p3), %s1341_s29, 2  ;;  %s1179_s16 = sshll.u32 (%p1429_p3), %s256_s14, 3 }
   0xf   : > { %s260_s19 = scalar_lea.vmem (%p1429_p3), %s1897_s0, %s1180_s15  ;;  %s258_s20 = scalar_lea.vmem (%p1429_p3), [#allocation8], %s1179_s16 }
  0x10   : > { %v277_v0 = vld [vmem:[%s260_s19] sm:$0xf] (%p1429_p3)  ;;  %v279_v1 = vld [vmem:[%s260_s19 + $0x8] sm:$0xf] (%p1429_p3) }
  0x11   : > { %278 = vst [vmem:[%s258_s20] sm:$0xf] (%p1429_p3), %v277_v0 }
  0x12   : > { %280 = vst [vmem:[%s258_s20 + $0x4] sm:$0xf] %v279_v1 }
  0x13 PF: > { %308 = sbr.rel (!%p1429_p3) target bundleno = 24 (0x18), region = 77  ;;  %s310_s21 = sand.u32 (%p1429_p3), 1, %s1337_s28  }
  0x14   : > { %s313_s24 = scalar_lea.vmem (%p1429_p3), %s1898_s1, %s1341_s29  ;;  %s1181_s25 = sshll.u32 (%p1429_p3), %s310_s21, 1 }
  0x15   : > { %v330_v2 = vld [vmem:[%s313_s24] sm:$0x1] (%p1429_p3)  ;;  %v332_v3 = vld [vmem:[%s313_s24 + $0x2] sm:$0x1] (%p1429_p3)  ;;  %s312_s26 = scalar_lea.vmem (%p1429_p3), [#allocation9], %s1181_s25 }
  0x16   : > { %331 = vst [vmem:[%s312_s26] sm:$0x1] (%p1429_p3), %v330_v2 }
  0x17   : > { %333 = vst [vmem:[%s312_s26 + $0x1] sm:$0x1] (%p1429_p3), %v332_v3 }
  0x18 PF: > { %353 = sbr.rel (!%p1429_p3) target bundleno = 29 (0x1d), region = 111  ;;  %s355_s10 = sand.u32 (%p1429_p3), 1, %s1337_s28  }
  0x19   : > { %s358_s15 = scalar_lea.vmem (%p1429_p3), %s1899_s2, %s1341_s29  ;;  %s1182_s16 = sshll.u32 (%p1429_p3), %s355_s10, 1 }
  0x1a   : > { %v375_v4 = vld [vmem:[%s358_s15] sm:$0x1] (%p1429_p3)  ;;  %v377_v5 = vld [vmem:[%s358_s15 + $0x2] sm:$0x1] (%p1429_p3)  ;;  %s357_s17 = scalar_lea.vmem (%p1429_p3), [#allocation10], %s1182_s16 }
  0x1b   : > { %376 = vst [vmem:[%s357_s17] sm:$0x1] (%p1429_p3), %v375_v4 }
  0x1c   : > { %378 = vst [vmem:[%s357_s17 + $0x1] sm:$0x1] (%p1429_p3), %v377_v5 }
  0x1d PF: > { %p1183_p5 = scmp.ge.s32.totalorder %s1341_s29, 1  ;;  %p397_p6 = scmp.lt.s32.totalorder %s1341_s29, 3 }
  0x1f   : > { %p398_p7 = pnand %p1183_p5, %p397_p6 }
  0x20   : > { %s404_s13 = sand.u32 (!%p398_p7), 1, %s1333_s27   ;;  %p1187_p8 = scmp.ne.s32.totalorder (!%p398_p7), %s1415_s30, 0 }
  0x21   : > { %401 = sbr.rel (%p398_p7) target bundleno = 442 (0x1ba), region = 145  ;;  %s1184_s18 = sshll.u32 (!%p398_p7), %s404_s13, 3 }
  0x22   : > { %s1458_s19 = sshll.u32 (!%p398_p7), %s404_s13, 1  ;;  %s406_s20 = scalar_lea.vmem (!%p398_p7), [#allocation8], %s1184_s18 }
  0x23   : > { %s413_s21 = scalar_lea.vmem (!%p398_p7), [#allocation9], %s1458_s19  ;;  %s420_s22 = scalar_lea.vmem (!%p398_p7), [#allocation10], %s1458_s19 }
  0x26   : > { %457 = sbr.rel (%p1187_p8) target bundleno = 50 (0x32), region = 161 }
  0x2b   : > { %vm458_vm0 = vcmask 29696   ;;  %v1343_v6 = vmov 0.0   ;;  %vm462_vm1 = vcmask 28672   ;;  %v1344_v7 = vmov inf  }
  0x2c   : > { %459 = vst.msk [vmem:[#allocation2] sm:$0x3f] %vm458_vm0, %v1343_v6  ;;  %v1345_v8 = vmov -inf  }
  0x2d   : > { %460 = vst.msk [vmem:[#allocation3] sm:$0x3f] %vm458_vm0, %v1344_v7 }
  0x2e   : > { %461 = vst.msk [vmem:[#allocation4] sm:$0x3f] %vm458_vm0, %v1345_v8 }
  0x2f   : > { %463 = vst.msk [vmem:[#allocation5] sm:$0x1f] %vm462_vm1, %v1343_v6 }
  0x30   : > { %464 = vst.msk [vmem:[#allocation6] sm:$0x1f] %vm462_vm1, %v1344_v7 }
  0x31   : > { %465 = vst.msk [vmem:[#allocation7] sm:$0x1f] %vm462_vm1, %v1345_v8 }
  0x32 PF: > { %v1463_v9 = vld [vmem:[%s406_s20] sm:$0xf]  ;;  %v470_v10 = vlaneseq  ;;  %v1465_v11 = vld [vmem:[%s413_s21] ss:$0 sm:$0xff]  ;;  %v1467_v12 = vld [vmem:[%s406_s20 + $0x4] sm:$0xf] }
  0x33   : > { %801 = vmatpush.xpose.msra.mxu3 %v1463_v9  ;;  %515 = vmatpush.xpose.msra.mxu1 %v1463_v9  ;;  %v1474_v14 = vld [vmem:[%s413_s21 + $0x1] ss:$0 sm:$0xff]  ;;  %v1346_v15 = vmov 0   ;;  %vm530_vm4 = vcmask 1043456   ;;  %v1560_v55 = vld [vmem:[%s420_s22] ss:$0 sm:$0xff] }
  0x34   : > { %v1472_v13 = vshrl.u32 %v470_v10, 7  ;;  %781 = vmatpush.xpose.msra.mxu2 %v1467_v12  ;;  %495 = vmatpush.xpose.msra.mxu0 %v1467_v12  ;;  %v1564_v56 = vld [vmem:[%s420_s22 + $0x1] ss:$0 sm:$0xff]  ;;  %p1196_p9 = scmp.ne.s32.totalorder %s1415_s30, 1 }
  0x35   : > { %s1349_s23 = smov (!%p1196_p9), 4   ;;  %s1350_s24 = smov (!%p1196_p9), 8  }
  0x36   : > { %vm474_vm2 = vcmp.eq.s32.totalorder %v1465_v11, %v1472_v13  ;;  %vm475_vm3 = vcmp.eq.s32.totalorder %v1474_v14, %v1472_v13  ;;  %vm760_vm13 = vcmp.eq.s32.totalorder %v1560_v55, %v1472_v13  ;;  %vm761_vm14 = vcmp.eq.s32.totalorder %v1564_v56, %v1472_v13  ;;  %s1351_s16 = smov (!%p1196_p9), 12  }
  0x37   : > { %v1486_v16 = vsel %vm474_vm2, 1, %v1346_v15  ;;  %v1492_v17 = vsel %vm475_vm3, 1, %v1346_v15  ;;  %v1585_v62 = vsel %vm760_vm13, 1, %v1346_v15  ;;  %v1591_v63 = vsel %vm761_vm14, 1, %v1346_v15 }
  0x38   : > { %v566_v18 = vperm.slane %v1486_v16, 1  ;;  %v524_v19 = vperm.slane %v1486_v16, 0  ;;  %v567_v20 = vperm.slane %v1492_v17, 1  ;;  %v525_v21 = vperm.slane %v1492_v17, 0 }
  0x39   : > { %v604_v33 = vperm.slane %v1486_v16, 2  ;;  %v605_v41 = vperm.slane %v1492_v17, 2  ;;  %v642_v47 = vperm.slane %v1486_v16, 3  ;;  %v643_v49 = vperm.slane %v1492_v17, 3 }
  0x3a   : > { %vm1498_vm5 = vcmp.eq.s32.totalorder %v566_v18, 1  ;;  %vm526_vm6 = vcmp.eq.s32.totalorder %v524_v19, 1  ;;  %vm1507_vm7 = vcmp.eq.s32.totalorder %v567_v20, 1  ;;  %vm527_vm8 = vcmp.eq.s32.totalorder %v525_v21, 1 }
  0x3b   : > { %v570_v23 = vsel %vm1498_vm5, %v1463_v9, inf  ;;  %v540_v24 = vsel %vm526_vm6, %v1463_v9, -inf  ;;  %v528_v25 = vsel %vm526_vm6, %v1463_v9, inf  ;;  %v571_v30 = vsel %vm1507_vm7, %v1467_v12, inf }
  0x3c   : > { %v572_v27 = vsel %vm530_vm4, %v570_v23, inf  ;;  %v542_v28 = vsel %vm530_vm4, %v540_v24, -inf  ;;  %v531_v29 = vsel %vm530_vm4, %v528_v25, inf  ;;  %v541_v31 = vsel %vm527_vm8, %v1467_v12, -inf }
  0x3d   : > { %573 = vmin.xlane.f32.xlu2 %v572_v27  ;;  %543 = vmax.xlane.f32.xlu1 %v542_v28  ;;  %v529_v32 = vsel %vm527_vm8, %v1467_v12, inf  ;;  %v575_v34 = vsel %vm530_vm4, %v571_v30, inf  ;;  %v545_v35 = vsel %vm530_vm4, %v541_v31, -inf  ;;  %vm1523_vm9 = vcmp.eq.s32.totalorder %v604_v33, 1 }
  0x3e   : > { %532 = vmin.xlane.f32.xlu0 %v531_v29  ;;  %v534_v36 = vsel %vm530_vm4, %v529_v32, inf  ;;  %v608_v38 = vsel %vm1523_vm9, %v1463_v9, inf  ;;  %v582_v39 = vsel %vm1507_vm7, %v1467_v12, -inf  ;;  %v581_v40 = vsel %vm1498_vm5, %v1463_v9, -inf }
  0x3f   : > { %v610_v42 = vsel %vm530_vm4, %v608_v38, inf  ;;  %v586_v43 = vsel %vm530_vm4, %v582_v39, -inf  ;;  %v583_v44 = vsel %vm530_vm4, %v581_v40, -inf  ;;  %vm607_vm10 = vcmp.eq.s32.totalorder %v605_v41, 1 }
  0x40   : > { %v620_v45 = vsel %vm607_vm10, %v1467_v12, -inf  ;;  %v619_v46 = vsel %vm1523_vm9, %v1463_v9, -inf  ;;  %v609_v48 = vsel %vm607_vm10, %v1467_v12, inf  ;;  %vm1550_vm11 = vcmp.eq.s32.totalorder %v642_v47, 1 }
  0x41   : > { %v624_v50 = vsel %vm530_vm4, %v620_v45, -inf  ;;  %v621_v51 = vsel %vm530_vm4, %v619_v46, -inf  ;;  %v613_v52 = vsel %vm530_vm4, %v609_v48, inf  ;;  %vm1554_vm12 = vcmp.eq.s32.totalorder %v643_v49, 1 }
  0x42   : > { %v657_v57 = vsel %vm1550_vm11, %v1463_v9, -inf  ;;  %v647_v58 = vsel %vm1554_vm12, %v1467_v12, inf  ;;  %v646_v59 = vsel %vm1550_vm11, %v1463_v9, inf  ;;  %v681_v60 = vperm.slane %v1492_v17, 4 }
  0x43   : > { %v680_v61 = vperm.slane %v1486_v16, 4  ;;  %v659_v0 = vsel %vm530_vm4, %v657_v57, -inf  ;;  %v651_v1 = vsel %vm530_vm4, %v647_v58, inf  ;;  %v648_v2 = vsel %vm530_vm4, %v646_v59, inf }
  0x44   : > { %vm1596_vm15 = vcmp.eq.s32.totalorder %v681_v60, 1  ;;  %v658_v7 = vsel %vm1554_vm12, %v1467_v12, -inf  ;;  %v718_v8 = vperm.slane %v1486_v16, 5  ;;  %v719_v23 = vperm.slane %v1492_v17, 5 }
  0x45   : > { %576 = vmin.xlane.f32.xlu2 %v575_v34  ;;  %546 = vmax.xlane.f32.xlu1 %v545_v35  ;;  %vm1600_vm0 = vcmp.eq.s32.totalorder %v680_v61, 1  ;;  %v685_v5 = vsel %vm1596_vm15, %v1467_v12, inf  ;;  %v662_v19 = vsel %vm530_vm4, %v658_v7, -inf  ;;  %v696_v16 = vsel %vm1596_vm15, %v1467_v12, -inf }
  0x46   : > { %535 = vmin.xlane.f32.xlu0 %v534_v36  ;;  %v684_v6 = vsel %vm1600_vm0, %v1463_v9, inf  ;;  %v689_v15 = vsel %vm530_vm4, %v685_v5, inf  ;;  %vm1617_vm1 = vcmp.eq.s32.totalorder %v718_v8, 1  ;;  %v695_v22 = vsel %vm1600_vm0, %v1463_v9, -inf }
  0x47   : > { %v686_v18 = vsel %vm530_vm4, %v684_v6, inf  ;;  %v722_v21 = vsel %vm1617_vm1, %v1463_v9, inf  ;;  %v700_v25 = vsel %vm530_vm4, %v696_v16, -inf  ;;  %v697_v26 = vsel %vm530_vm4, %v695_v22, -inf }
  0x48   : > { %v724_v24 = vsel %vm530_vm4, %v722_v21, inf  ;;  %vm721_vm5 = vcmp.eq.s32.totalorder %v719_v23, 1  ;;  %v733_v28 = vsel %vm1617_vm1, %v1463_v9, -inf  ;;  %v810_v17 = vperm.slane %v1585_v62, 0 }
  0x49   : > { %v734_v27 = vsel %vm721_vm5, %v1467_v12, -inf  ;;  %v723_v29 = vsel %vm721_vm5, %v1467_v12, inf  ;;  %v811_v30 = vperm.slane %v1591_v63, 0  ;;  %v735_v32 = vsel %vm530_vm4, %v733_v28, -inf }
  0x4a   : > { %v738_v31 = vsel %vm530_vm4, %v734_v27, -inf  ;;  %v727_v33 = vsel %vm530_vm4, %v723_v29, inf  ;;  %vm812_vm6 = vcmp.eq.s32.totalorder %v810_v17, 1  ;;  %v849_v38 = vperm.slane %v1591_v63, 1 }
  0x4b   : > { %vm1644_vm7 = vcmp.eq.s32.totalorder %v811_v30, 1  ;;  %v825_v35 = vsel %vm812_vm6, %v1463_v9, -inf  ;;  %v814_v37 = vsel %vm812_vm6, %v1463_v9, inf  ;;  %v848_v39 = vperm.slane %v1585_v62, 1 }
  0x4c   : > { %v815_v36 = vsel %vm1644_vm7, %v1467_v12, inf  ;;  %v827_v40 = vsel %vm530_vm4, %v825_v35, -inf  ;;  %vm1658_vm8 = vcmp.eq.s32.totalorder %v849_v38, 1  ;;  %v1347_v47 = vmov 1.0  }
  0x4d   : > { %611 = vmin.xlane.f32.xlu2 %v610_v42  ;;  %587 = vmax.xlane.f32.xlu1 %v586_v43  ;;  %v819_v41 = vsel %vm530_vm4, %v815_v36, inf  ;;  %v816_v42 = vsel %vm530_vm4, %v814_v37, inf  ;;  %vm1662_vm9 = vcmp.eq.s32.totalorder %v848_v39, 1  ;;  %v853_v45 = vsel %vm1658_vm8, %v1467_v12, inf  ;;  %v560_v43 = vld [vmem:[#allocation4] sm:$0x1] }
  0x4e   : > { %584 = vmax.xlane.f32.xlu0 %v583_v44  ;;  %v852_v46 = vsel %vm1662_vm9, %v1463_v9, inf  ;;  %1194 = vmatmul.msk.f32.vlgmr.msra.gmra.mxu2 %vm761_vm14, %v1347_v47  ;;  %v826_v48 = vsel %vm1644_vm7, %v1467_v12, -inf  ;;  %v886_v49 = vperm.slane %v1585_v62, 2  ;;  %v864_v11 = vsel %vm1658_vm8, %v1467_v12, -inf }
  0x4f   : > { %1195 = vmatmul.msk.f32.vlgmr.msra.gmra.mxu3 %vm760_vm13, %v1347_v47  ;;  %1190 = vmatmul.msk.f32.vlgmr.msra.gmra.mxu0 %vm475_vm3, %v1347_v47  ;;  %v863_v13 = vsel %vm1662_vm9, %v1463_v9, -inf  ;;  %v887_v54 = vperm.slane %v1591_v63, 2  ;;  %v868_v56 = vsel %vm530_vm4, %v864_v11, -inf  ;;  %v924_v61 = vperm.slane %v1585_v62, 3 }
  0x50   : > { %1191 = vmatmul.msk.f32.vlgmr.msra.gmra.mxu1 %vm474_vm2, %v1347_v47  ;;  %vm1691_vm10 = vcmp.eq.s32.totalorder %v886_v49, 1  ;;  %v865_v57 = vsel %vm530_vm4, %v863_v13, -inf  ;;  %v963_v8 = vperm.slane %v1591_v63, 4  ;;  %vm558_vm14 = vcmask 24576  }
  0x51   : > { %v890_v14 = vsel %vm1691_vm10, %v1463_v9, inf  ;;  %vm889_vm2 = vcmp.eq.s32.totalorder %v887_v54, 1  ;;  %v901_v59 = vsel %vm1691_vm10, %v1463_v9, -inf  ;;  %vm926_vm3 = vcmp.eq.s32.totalorder %v924_v61, 1  ;;  %v598_v54 = vld [vmem:[#allocation4 + $0x1] sm:$0x1] }
  0x52   : > { %v892_v55 = vsel %vm530_vm4, %v890_v14, inf  ;;  %v902_v58 = vsel %vm889_vm2, %v1467_v12, -inf  ;;  %v891_v60 = vsel %vm889_vm2, %v1467_v12, inf  ;;  %v939_v5 = vsel %vm926_vm3, %v1463_v9, -inf }
  0x53   : > { %v895_v3 = vsel %vm530_vm4, %v891_v60, inf  ;;  %v928_v7 = vsel %vm926_vm3, %v1463_v9, inf  ;;  %vm1732_vm12 = vcmp.eq.s32.totalorder %v963_v8, 1  ;;  %vm522_vm15 = vcmask 29696  }
  0x54   : > { %v930_v20 = vsel %vm530_vm4, %v928_v7, inf  ;;  %vm808_vm0 = vcmask 28672  }
  0x55   : > { %625 = vmax.xlane.f32.xlu2 %v624_v50  ;;  %622 = vmax.xlane.f32.xlu1 %v621_v51  ;;  %v857_v50 = vsel %vm530_vm4, %v853_v45, inf  ;;  %v854_v51 = vsel %vm530_vm4, %v852_v46, inf  ;;  %v551_v46 = vld [vmem:[#allocation3] sm:$0x1] }
  0x56   : > { %614 = vmin.xlane.f32.xlu0 %v613_v52  ;;  %v830_v52 = vsel %vm530_vm4, %v826_v48, -inf }
  0x5d   : > { %660 = vmax.xlane.f32.xlu2 %v659_v0  ;;  %652 = vmin.xlane.f32.xlu1 %v651_v1  ;;  %v925_v0 = vperm.slane %v1591_v63, 3  ;;  %v906_v1 = vsel %vm530_vm4, %v902_v58, -inf }
  0x5e   : > { %649 = vmin.xlane.f32.xlu0 %v648_v2  ;;  %v903_v2 = vsel %vm530_vm4, %v901_v59, -inf }
  0x5f   : > { %vm1718_vm11 = vcmp.eq.s32.totalorder %v925_v0, 1 }
  0x60   : > { %v929_v6 = vsel %vm1718_vm11, %v1467_v12, inf  ;;  %v940_v22 = vsel %vm1718_vm11, %v1467_v12, -inf }
  0x65   : > { %690 = vmin.xlane.f32.xlu2 %v689_v15  ;;  %687 = vmin.xlane.f32.xlu1 %v686_v18  ;;  %v962_v15 = vperm.slane %v1585_v62, 4  ;;  %v941_v18 = vsel %vm530_vm4, %v939_v5, -inf  ;;  %v967_v62 = vsel %vm1732_vm12, %v1467_v12, inf }
  0x66   : > { %663 = vmax.xlane.f32.xlu0 %v662_v19  ;;  %v933_v19 = vsel %vm530_vm4, %v929_v6, inf  ;;  %v971_v23 = vsel %vm530_vm4, %v967_v62, inf  ;;  %v630_v6 = vld [vmem:[#allocation3 + $0x2] sm:$0x1] }
  0x67   : > { %vm1736_vm13 = vcmp.eq.s32.totalorder %v962_v15, 1 }
  0x68   : > { %v966_v63 = vsel %vm1736_vm13, %v1463_v9, inf  ;;  %v977_v27 = vsel %vm1736_vm13, %v1463_v9, -inf }
  0x69   : > { %v979_v29 = vsel %vm530_vm4, %v977_v27, -inf }
  0x6d   : > { %725 = vmin.xlane.f32.xlu2 %v724_v24  ;;  %701 = vmax.xlane.f32.xlu1 %v700_v25  ;;  %v968_v24 = vsel %vm530_vm4, %v966_v63, inf  ;;  %v944_v25 = vsel %vm530_vm4, %v940_v22, -inf  ;;  %v668_v63 = vld [vmem:[#allocation3 + $0x3] sm:$0x1] }
  0x6e   : > { %698 = vmax.xlane.f32.xlu0 %v697_v26  ;;  %v978_v26 = vsel %vm1732_vm12, %v1467_v12, -inf }
  0x6f   : > { %v982_v28 = vsel %vm530_vm4, %v978_v26, -inf }
  0x75   : > { %739 = vmax.xlane.f32.xlu2 %v738_v31  ;;  %736 = vmax.xlane.f32.xlu1 %v735_v32 }
  0x76   : > { %728 = vmin.xlane.f32.xlu0 %v727_v33  ;;  %v1762_v33 = vand.u32 127, %v470_v10 }
  0x7d   : > { %828 = vmax.xlane.f32.xlu2 %v827_v40  ;;  %820 = vmin.xlane.f32.xlu1 %v819_v41 }
  0x7e   : > { %817 = vmin.xlane.f32.xlu0 %v816_v42  ;;  %v592_v42 = vld [vmem:[#allocation3 + $0x1] sm:$0x1] }
  0x85   : > { %858 = vmin.xlane.f32.xlu2 %v857_v50  ;;  %855 = vmin.xlane.f32.xlu1 %v854_v51 }
  0x86   : > { %831 = vmax.xlane.f32.xlu0 %v830_v52 }
  0x8d   : > { %893 = vmin.xlane.f32.xlu2 %v892_v55  ;;  %869 = vmax.xlane.f32.xlu1 %v868_v56 }
  0x8e   : > { %866 = vmax.xlane.f32.xlu0 %v865_v57 }
  0x95   : > { %907 = vmax.xlane.f32.xlu2 %v906_v1  ;;  %904 = vmax.xlane.f32.xlu1 %v903_v2 }
  0x96   : > { %896 = vmin.xlane.f32.xlu0 %v895_v3  ;;  %v636_v3 = vld [vmem:[#allocation4 + $0x2] sm:$0x1] }
  0x9d   : > { %942 = vmax.xlane.f32.xlu2 %v941_v18  ;;  %934 = vmin.xlane.f32.xlu1 %v933_v19 }
  0x9e   : > { %931 = vmin.xlane.f32.xlu0 %v930_v20 }
  0xa5   : > { %972 = vmin.xlane.f32.xlu2 %v971_v23  ;;  %969 = vmin.xlane.f32.xlu1 %v968_v24 }
  0xa6   : > { %945 = vmax.xlane.f32.xlu0 %v944_v25 }
  0xad   : > { %983 = vmax.xlane.f32.xlu1 %v982_v28 }
  0xae   : > { %980 = vmax.xlane.f32.xlu0 %v979_v29 }
  0xb0   : > { %v574_v17 = vpop.xlane.xlu2 %573  ;;  %v544_v30 = vpop.xlane.xlu1 %543 }
  0xb1   : > { %v533_v31 = vpop.xlane.xlu0 %532  ;;  %v578_v32 = vsel %vm530_vm4, %v574_v17, inf  ;;  %v548_v35 = vsel %vm530_vm4, %v544_v30, -inf }
  0xb2   : > { %v537_v38 = vsel %vm530_vm4, %v533_v31, inf  ;;  %v706_v31 = vld [vmem:[#allocation3 + $0x4] sm:$0x1] }
  0xb8   : > { %v577_v34 = vpop.xlane.xlu2 %576  ;;  %v547_v12 = vpop.xlane.xlu1 %546 }
  0xb9   : > { %v579_v9 = vsel %vm530_vm4, %v577_v34, inf  ;;  %v549_v36 = vsel %vm530_vm4, %v547_v12, -inf  ;;  %v536_v37 = vpop.xlane.xlu0 %535  ;;  %v674_v12 = vld [vmem:[#allocation4 + $0x3] sm:$0x1] }
  0xba   : > { %v580_v39 = vmin.f32 %v578_v32, %v579_v9  ;;  %v550_v40 = vmax.f32 %v548_v35, %v549_v36  ;;  %v538_v41 = vsel %vm530_vm4, %v536_v37, inf }
  0xbb   : > { %v539_v44 = vmin.f32 %v537_v38, %v538_v41 }
  0xbc   : > { %v594_v10 = vperm.slane %v580_v39, %v1762_v33  ;;  %v562_v45 = vperm.slane %v550_v40, %v1762_v33 }
  0xbd   : > { %v555_v47 = vperm.slane %v539_v44, %v1762_v33 }
  0xbe   : > { %v596_v48 = vmin.f32 %v592_v42, %v594_v10  ;;  %v564_v49 = vmax.f32 %v560_v43, %v562_v45  ;;  %v712_v43 = vld [vmem:[#allocation4 + $0x4] sm:$0x1] }
  0xbf   : > { %v557_v50 = vmin.f32 %v551_v46, %v555_v47 }
  0xc0   : > { %597 = vst.msk [vmem:[#allocation3 + $0x1] sm:$0x1] %vm558_vm14, %v596_v48  ;;  %v612_v51 = vpop.xlane.xlu2 %611  ;;  %v588_v52 = vpop.xlane.xlu1 %587 }
  0xc1   : > { %565 = vst.msk [vmem:[#allocation4] sm:$0x1] %vm558_vm14, %v564_v49  ;;  %v590_v53 = vsel %vm530_vm4, %v588_v52, -inf  ;;  %v585_v14 = vpop.xlane.xlu0 %584  ;;  %v616_v57 = vsel %vm530_vm4, %v612_v51, inf }
  0xc2   : > { %559 = vst.msk [vmem:[#allocation3] sm:$0x1] %vm558_vm14, %v557_v50  ;;  %v589_v11 = vsel %vm530_vm4, %v585_v14, -inf }
  0xc3   : > { %v591_v13 = vmax.f32 %v589_v11, %v590_v53  ;;  %v750_v53 = vld [vmem:[#allocation4 + $0x5] sm:$0x1] }
  0xc5   : > { %v600_v55 = vperm.slane %v591_v13, %v1762_v33  ;;  %v744_v13 = vld [vmem:[#allocation3 + $0x5] sm:$0x1] }
  0xc7   : > { %v602_v56 = vmax.f32 %v598_v54, %v600_v55 }
  0xc8   : > { %v626_v58 = vpop.xlane.xlu2 %625  ;;  %v623_v59 = vpop.xlane.xlu1 %622 }
  0xc9   : > { %603 = vst.msk [vmem:[#allocation4 + $0x1] sm:$0x1] %vm558_vm14, %v602_v56  ;;  %v628_v60 = vsel %vm530_vm4, %v626_v58, -inf  ;;  %v627_v61 = vsel %vm530_vm4, %v623_v59, -inf  ;;  %v615_v0 = vpop.xlane.xlu0 %614 }
  0xca   : > { %v629_v1 = vmax.f32 %v627_v61, %v628_v60  ;;  %v617_v2 = vsel %vm530_vm4, %v615_v0, inf }
  0xcb   : > { %v618_v4 = vmin.f32 %v616_v57, %v617_v2 }
  0xcc   : > { %v638_v5 = vperm.slane %v629_v1, %v1762_v33  ;;  %v836_v1 = vld [vmem:[#allocation6] sm:$0x1] }
  0xcd   : > { %v632_v7 = vperm.slane %v618_v4, %v1762_v33 }
  0xce   : > { %v640_v8 = vmax.f32 %v636_v3, %v638_v5 }
  0xcf   : > { %v634_v15 = vmin.f32 %v630_v6, %v632_v7 }
  0xd0   : > { %641 = vst.msk [vmem:[#allocation4 + $0x2] sm:$0x1] %vm558_vm14, %v640_v8  ;;  %v661_v18 = vpop.xlane.xlu2 %660  ;;  %v653_v19 = vpop.xlane.xlu1 %652 }
  0xd1   : > { %635 = vst.msk [vmem:[#allocation3 + $0x2] sm:$0x1] %vm558_vm14, %v634_v15  ;;  %v655_v20 = vsel %vm530_vm4, %v653_v19, inf  ;;  %v650_v21 = vpop.xlane.xlu0 %649  ;;  %v665_v24 = vsel %vm530_vm4, %v661_v18, -inf }
  0xd2   : > { %v654_v16 = vsel %vm530_vm4, %v650_v21, inf }
  0xd3   : > { %v656_v62 = vmin.f32 %v654_v16, %v655_v20  ;;  %v874_v20 = vld [vmem:[#allocation6 + $0x1] sm:$0x1] }
  0xd5   : > { %v670_v22 = vperm.slane %v656_v62, %v1762_v33  ;;  %v842_v62 = vld [vmem:[#allocation7] sm:$0x1] }
  0xd7   : > { %v672_v23 = vmin.f32 %v668_v63, %v670_v22 }
  0xd8   : > { %v691_v25 = vpop.xlane.xlu2 %690  ;;  %v688_v26 = vpop.xlane.xlu1 %687 }
  0xd9   : > { %673 = vst.msk [vmem:[#allocation3 + $0x3] sm:$0x1] %vm558_vm14, %v672_v23  ;;  %v693_v27 = vsel %vm530_vm4, %v691_v25, inf  ;;  %v692_v28 = vsel %vm530_vm4, %v688_v26, inf  ;;  %v664_v29 = vpop.xlane.xlu0 %663 }
  0xda   : > { %v694_v17 = vmin.f32 %v692_v28, %v693_v27  ;;  %v666_v30 = vsel %vm530_vm4, %v664_v29, -inf }
  0xdb   : > { %v667_v32 = vmax.f32 %v665_v24, %v666_v30 }
  0xdc   : > { %v708_v34 = vperm.slane %v694_v17, %v1762_v33  ;;  %v880_v17 = vld [vmem:[#allocation7 + $0x1] sm:$0x1] }
  0xdd   : > { %v676_v35 = vperm.slane %v667_v32, %v1762_v33  ;;  %v517_v32 = vpop.f32.mrf.mxu1 }
  0xde   : > { %v710_v9 = vmin.f32 %v706_v31, %v708_v34  ;;  %v497_v31 = vpop.f32.mrf.mxu0 }
  0xdf   : > { %v678_v36 = vmax.f32 %v674_v12, %v676_v35  ;;  %v518_v34 = vadd.f32 %v517_v32, %v497_v31  ;;  %v783_v12 = vpop.f32.mrf.mxu2  ;;  %v803_v35 = vpop.f32.mrf.mxu3 }
  0xe0   : > { %711 = vst.msk [vmem:[#allocation3 + $0x4] sm:$0x1] %vm558_vm14, %v710_v9  ;;  %v726_v37 = vpop.xlane.xlu2 %725  ;;  %v702_v38 = vpop.xlane.xlu1 %701 }
  0xe1   : > { %679 = vst.msk [vmem:[#allocation4 + $0x3] sm:$0x1] %vm558_vm14, %v678_v36  ;;  %v704_v39 = vsel %vm530_vm4, %v702_v38, -inf  ;;  %v699_v40 = vpop.xlane.xlu0 %698  ;;  %v730_v45 = vsel %vm530_vm4, %v726_v37, inf  ;;  %v520_v36 = vld [vmem:[#allocation2] sm:$0x3f]  ;;  %v804_v37 = vadd.f32 %v803_v35, %v783_v12 }
  0xe2   : > { %v703_v41 = vsel %vm530_vm4, %v699_v40, -inf  ;;  %v806_v38 = vld [vmem:[#allocation5] sm:$0x1f] }
  0xe3   : > { %v705_v42 = vmax.f32 %v703_v41, %v704_v39 }
  0xe5   : > { %v714_v44 = vperm.slane %v705_v42, %v1762_v33  ;;  %v521_v42 = vadd.f32 %v520_v36, %v518_v34 }
  0xe7   : > { %v716_v10 = vmax.f32 %v712_v43, %v714_v44  ;;  %523 = vst.msk [vmem:[#allocation2] sm:$0x3f] %vm522_vm15, %v521_v42 }
  0xe8   : > { %v740_v46 = vpop.xlane.xlu2 %739  ;;  %v737_v47 = vpop.xlane.xlu1 %736 }
  0xe9   : > { %717 = vst.msk [vmem:[#allocation4 + $0x4] sm:$0x1] %vm558_vm14, %v716_v10  ;;  %v742_v48 = vsel %vm530_vm4, %v740_v46, -inf  ;;  %v741_v49 = vsel %vm530_vm4, %v737_v47, -inf  ;;  %v729_v50 = vpop.xlane.xlu0 %728 }
  0xea   : > { %v743_v51 = vmax.f32 %v741_v49, %v742_v48  ;;  %v731_v52 = vsel %vm530_vm4, %v729_v50, inf  ;;  %v918_v48 = vld [vmem:[#allocation7 + $0x2] sm:$0x1] }
  0xeb   : > { %v732_v14 = vmin.f32 %v730_v45, %v731_v52  ;;  %v807_v45 = vadd.f32 %v806_v38, %v804_v37 }
  0xec   : > { %v752_v11 = vperm.slane %v743_v51, %v1762_v33  ;;  %v912_v51 = vld [vmem:[#allocation6 + $0x2] sm:$0x1] }
  0xed   : > { %v746_v54 = vperm.slane %v732_v14, %v1762_v33  ;;  %809 = vst.msk [vmem:[#allocation5] sm:$0x1f] %vm808_vm0, %v807_v45 }
  0xee   : > { %v754_v55 = vmax.f32 %v750_v53, %v752_v11 }
  0xef   : > { %v748_v56 = vmin.f32 %v744_v13, %v746_v54 }
  0xf0   : > { %755 = vst.msk [vmem:[#allocation4 + $0x5] sm:$0x1] %vm558_vm14, %v754_v55  ;;  %v829_v57 = vpop.xlane.xlu2 %828  ;;  %v821_v58 = vpop.xlane.xlu1 %820 }
  0xf1   : > { %749 = vst.msk [vmem:[#allocation3 + $0x5] sm:$0x1] %vm558_vm14, %v748_v56  ;;  %v823_v59 = vsel %vm530_vm4, %v821_v58, inf  ;;  %v818_v60 = vpop.xlane.xlu0 %817  ;;  %v833_v4 = vsel %vm530_vm4, %v829_v57, -inf  ;;  %v950_v58 = vld [vmem:[#allocation6 + $0x3] sm:$0x1] }
  0xf2   : > { %v822_v61 = vsel %vm530_vm4, %v818_v60, inf }
  0xf3   : > { %v824_v0 = vmin.f32 %v822_v61, %v823_v59 }
  0xf5   : > { %v838_v2 = vperm.slane %v824_v0, %v1762_v33 }
  0xf7   : > { %v840_v3 = vmin.f32 %v836_v1, %v838_v2 }
  0xf8   : > { %v859_v5 = vpop.xlane.xlu2 %858  ;;  %v856_v6 = vpop.xlane.xlu1 %855 }
  0xf9   : > { %841 = vst.msk [vmem:[#allocation6] sm:$0x1] %vm558_vm14, %v840_v3  ;;  %v861_v7 = vsel %vm530_vm4, %v859_v5, inf  ;;  %v860_v8 = vsel %vm530_vm4, %v856_v6, inf  ;;  %v832_v15 = vpop.xlane.xlu0 %831 }
  0xfa   : > { %v862_v18 = vmin.f32 %v860_v8, %v861_v7  ;;  %v834_v19 = vsel %vm530_vm4, %v832_v15, -inf  ;;  %v988_v7 = vld [vmem:[#allocation6 + $0x4] sm:$0x1] }
  0xfb   : > { %v835_v21 = vmax.f32 %v833_v4, %v834_v19 }
  0xfc   : > { %v876_v16 = vperm.slane %v862_v18, %v1762_v33  ;;  %v956_v18 = vld [vmem:[#allocation7 + $0x3] sm:$0x1] }
  0xfd   : > { %v844_v63 = vperm.slane %v835_v21, %v1762_v33 }
  0xfe   : > { %v878_v22 = vmin.f32 %v874_v20, %v876_v16 }
  0xff   : > { %v846_v23 = vmax.f32 %v842_v62, %v844_v63 }
 0x100   : > { %879 = vst.msk [vmem:[#allocation6 + $0x1] sm:$0x1] %vm558_vm14, %v878_v22  ;;  %v894_v24 = vpop.xlane.xlu2 %893  ;;  %v870_v25 = vpop.xlane.xlu1 %869 }
 0x101   : > { %847 = vst.msk [vmem:[#allocation7] sm:$0x1] %vm558_vm14, %v846_v23  ;;  %v872_v26 = vsel %vm530_vm4, %v870_v25, -inf  ;;  %v867_v27 = vpop.xlane.xlu0 %866  ;;  %v898_v39 = vsel %vm530_vm4, %v894_v24, inf  ;;  %v994_v24 = vld [vmem:[#allocation7 + $0x4] sm:$0x1] }
 0x102   : > { %v871_v28 = vsel %vm530_vm4, %v867_v27, -inf }
 0x103   : > { %v873_v29 = vmax.f32 %v871_v28, %v872_v26 }
 0x105   : > { %v882_v30 = vperm.slane %v873_v29, %v1762_v33 }
 0x107   : > { %v884_v9 = vmax.f32 %v880_v17, %v882_v30 }
 0x108   : > { %v908_v40 = vpop.xlane.xlu2 %907  ;;  %v905_v41 = vpop.xlane.xlu1 %904 }
 0x109   : > { %885 = vst.msk [vmem:[#allocation7 + $0x1] sm:$0x1] %vm558_vm14, %v884_v9  ;;  %v910_v43 = vsel %vm530_vm4, %v908_v40, -inf  ;;  %v909_v44 = vsel %vm530_vm4, %v905_v41, -inf  ;;  %v897_v10 = vpop.xlane.xlu0 %896 }
 0x10a   : > { %v911_v46 = vmax.f32 %v909_v44, %v910_v43  ;;  %v899_v47 = vsel %vm530_vm4, %v897_v10, inf }
 0x10b   : > { %v900_v49 = vmin.f32 %v898_v39, %v899_v47 }
 0x10c   : > { %v920_v50 = vperm.slane %v911_v46, %v1762_v33 }
 0x10d   : > { %v914_v52 = vperm.slane %v900_v49, %v1762_v33 }
 0x10e   : > { %v922_v53 = vmax.f32 %v918_v48, %v920_v50 }
 0x10f   : > { %v916_v14 = vmin.f32 %v912_v51, %v914_v52 }
 0x110   : > { %923 = vst.msk [vmem:[#allocation7 + $0x2] sm:$0x1] %vm558_vm14, %v922_v53  ;;  %v943_v11 = vpop.xlane.xlu2 %942  ;;  %v935_v13 = vpop.xlane.xlu1 %934 }
 0x111   : > { %917 = vst.msk [vmem:[#allocation6 + $0x2] sm:$0x1] %vm558_vm14, %v916_v14  ;;  %v937_v54 = vsel %vm530_vm4, %v935_v13, inf  ;;  %v932_v55 = vpop.xlane.xlu0 %931  ;;  %v947_v61 = vsel %vm530_vm4, %v943_v11, -inf }
 0x112   : > { %v936_v56 = vsel %vm530_vm4, %v932_v55, inf }
 0x113   : > { %v938_v57 = vmin.f32 %v936_v56, %v937_v54 }
 0x115   : > { %v952_v59 = vperm.slane %v938_v57, %v1762_v33 }
 0x117   : > { %v954_v60 = vmin.f32 %v950_v58, %v952_v59 }
 0x118   : > { %v973_v0 = vpop.xlane.xlu2 %972  ;;  %v970_v1 = vpop.xlane.xlu1 %969 }
 0x119   : > { %955 = vst.msk [vmem:[#allocation6 + $0x3] sm:$0x1] %vm558_vm14, %v954_v60  ;;  %v975_v2 = vsel %vm530_vm4, %v973_v0, inf  ;;  %v974_v3 = vsel %vm530_vm4, %v970_v1, inf  ;;  %v946_v4 = vpop.xlane.xlu0 %945 }
 0x11a   : > { %v976_v5 = vmin.f32 %v974_v3, %v975_v2  ;;  %v948_v6 = vsel %vm530_vm4, %v946_v4, -inf }
 0x11b   : > { %v949_v8 = vmax.f32 %v947_v61, %v948_v6 }
 0x11c   : > { %v990_v15 = vperm.slane %v976_v5, %v1762_v33 }
 0x11d   : > { %v958_v19 = vperm.slane %v949_v8, %v1762_v33 }
 0x11e   : > { %v992_v20 = vmin.f32 %v988_v7, %v990_v15 }
 0x11f   : > { %v960_v21 = vmax.f32 %v956_v18, %v958_v19 }
 0x120   : > { %993 = vst.msk [vmem:[#allocation6 + $0x4] sm:$0x1] %vm558_vm14, %v992_v20  ;;  %v984_v16 = vpop.xlane.xlu1 %983 }
 0x121   : > { %961 = vst.msk [vmem:[#allocation7 + $0x3] sm:$0x1] %vm558_vm14, %v960_v21  ;;  %v986_v62 = vsel %vm530_vm4, %v984_v16, -inf  ;;  %v981_v63 = vpop.xlane.xlu0 %980 }
 0x122   : > { %v985_v22 = vsel %vm530_vm4, %v981_v63, -inf }
 0x123   : > { %v987_v23 = vmax.f32 %v985_v22, %v986_v62 }
 0x125   : > { %v996_v25 = vperm.slane %v987_v23, %v1762_v33  ;;  %1003 = sbr.rel (%p1196_p9) target bundleno = 432 (0x1b0), region = 165 }
 0x127   : > { %v998_v26 = vmax.f32 %v994_v24, %v996_v25 }
 0x129   : > { %999 = vst.msk [vmem:[#allocation7 + $0x4] sm:$0x1] %vm558_vm14, %v998_v26 }
 0x12a   : > { %v1013_v27 = vld [vmem:[#allocation3] sm:$0x3f]  ;;  %v1005_v28 = vld [vmem:[%s1900_s3] sm:$0x3f]  ;;  %v1348_v29 = vmov 0   ;;  %vm1018_vm4 = vcmask 62496  }
 0x12b   : > { %1254 = vset.pattern.permute.xlu0 %v1348_v29  ;;  %1015 = vrot.lane.b32.xlu1 %v1013_v27, %s1349_s23  ;;  %v1020_v17 = vld [vmem:[#allocation4] sm:$0x3f]  ;;  %v1043_v33 = vld [vmem:[#allocation6] sm:$0x1f]  ;;  %vm1025_vm1 = vcmask 95296   ;;  %vm1048_vm5 = vcmask 61472  }
 0x12c   : > { %1008 = vperm.xlu0 %1254, %v1005_v28   ;;  %1022 = vrot.lane.b32.xlu2 %v1020_v17, %s1350_s24  ;;  %v1035_v30 = vld [vmem:[%s1902_s5] sm:$0x1f]  ;;  %v1034_v38 = vld [vmem:[#allocation5] sm:$0x1f]  ;;  %vm1055_vm6 = vcmask 94272   ;;  %vm1062_vm7 = vcmask 102496  }
 0x12d   : > { %v1057_v32 = vld [vmem:[%s1903_s6] sm:$0x1f]  ;;  %vm1032_vm8 = vcmask 103520  }
 0x12e   : > { %v1027_v34 = vld [vmem:[%s1901_s4] sm:$0x3f] }
 0x12f   : > { %v1004_v12 = vld [vmem:[#allocation2] sm:$0x3f] }
 0x130   : > { %v1050_v31 = vld [vmem:[#allocation7] sm:$0x1f] }
 0x133   : > { %1045 = vrot.lane.b32.xlu1 %v1043_v33, %s1349_s23 }
 0x134   : > { %1038 = vperm.xlu0 %1254, %v1035_v30   ;;  %1052 = vrot.lane.b32.xlu2 %v1050_v31, %s1350_s24 }
 0x13b   : > { %1059 = vrot.lane.b32.xlu1 %v1057_v32, %s1351_s16 }
 0x13c   : > { %1029 = vrot.lane.b32.xlu0 %v1027_v34, %s1351_s16 }
 0x186   : > { %v1023_v36 = vpop.permute.xlu2 %1022 }
 0x18e   : > { %v1053_v42 = vpop.permute.xlu2 %1052 }
 0x19d   : > { %v1016_v35 = vpop.permute.xlu1 %1015 }
 0x19e   : > { %v1009_v9 = vpop.permute.xlu0 %1008 }
 0x19f   : > { %v1011_v37 = vmul.f32 %v1009_v9, %v1004_v12 }
 0x1a1   : > { %1012 = vst.msk [vmem:[#allocation11] sm:$0x3f] %vm522_vm15, %v1011_v37 }
 0x1a2   : > { %1019 = vst.msk [vmem:[#allocation11] sm:$0x3f] %vm1018_vm4, %v1016_v35 }
 0x1a3   : > { %1026 = vst.msk [vmem:[#allocation11] sm:$0x3f] %vm1025_vm1, %v1023_v36 }
 0x1a5   : > { %v1046_v39 = vpop.permute.xlu1 %1045 }
 0x1a6   : > { %v1039_v40 = vpop.permute.xlu0 %1038 }
 0x1a7   : > { %v1041_v41 = vmul.f32 %v1039_v40, %v1034_v38 }
 0x1a9   : > { %1042 = vst.msk [vmem:[#allocation13] sm:$0x1f] %vm808_vm0, %v1041_v41 }
 0x1aa   : > { %1049 = vst.msk [vmem:[#allocation13] sm:$0x1f] %vm1048_vm5, %v1046_v39 }
 0x1ab   : > { %1056 = vst.msk [vmem:[#allocation13] sm:$0x1f] %vm1055_vm6, %v1053_v42 }
 0x1ad   : > { %v1060_v43 = vpop.permute.xlu1 %1059 }
 0x1ae   : > { %1063 = vst.msk [vmem:[#allocation13] sm:$0x1f] %vm1062_vm7, %v1060_v43  ;;  %v1030_v44 = vpop.permute.xlu0 %1029 }
 0x1af   : > { %1033 = vst.msk [vmem:[#allocation11] sm:$0x3f] %vm1032_vm8, %v1030_v44 }
 0x1b0 PF: > { %p1211_p10 = scmp.eq.s32.totalorder %s1415_s30, 1  ;;  %s1352_s17 = smov [#allocation11]  }
 0x1b1   : > { %s1070_s13 = sshll.u32 %s1352_s17, 4  ;;  %s1072_s20 = sshll.u32 %s1904_s7, 4  ;;  %s1071_s13 = int_to_ptr.vmem [resolvable:$true] %s1070_s13  ;;  %s1073_s20 = int_to_ptr.hbm [resolvable:$true] %s1072_s20 }
 0x1b2   : > { %1204 = dma.vmem_to_hbm [thread:$0]  (%p1211_p10), %s1071_s13, 128, %s1073_s20, [#allocation12]  }
 0x1b3   : > { %s1084_s27 = sshll.u32 %s1905_s8, 4  ;;  %s1353_s29 = smov [#allocation13]   ;;  %s1085_s27 = int_to_ptr.hbm [resolvable:$true] %s1084_s27 }
 0x1b4   : > { %s1082_s23 = sshll.u32 %s1353_s29, 4  ;;  %s1083_s23 = int_to_ptr.vmem [resolvable:$true] %s1082_s23 }
 0x1b5   : > { %1206 = dma.vmem_to_hbm [thread:$0]  (%p1211_p10), %s1083_s23, 128, %s1085_s27, [#allocation14]  }
 0x1b6   : > { %1324 = dma.done.wait (%p1211_p10), [#allocation12], 128  }
 0x1b7   : > { %1326 = vsyncadd (%p1211_p10), [#allocation12], 4294967168 }
 0x1b8   : > { %1328 = dma.done.wait (%p1211_p10), [#allocation14], 128  }
 0x1b9   : > { %1330 = vsyncadd (%p1211_p10), [#allocation14], 4294967168 }
 0x1ba PF: > { %p18_p11 = scmp.ge.s32.totalorder %s1418_s9, 4   ;;  %s1937_s27 = smov %s1337_s28 }
 0x1bb   : > { %s1938_s28 = smov %s1427_s12  ;;  %s1939_s29 = smov %s1418_s9 }
 0x1bc   :  { %20 = sbr.rel (!%p18_p11) target bundleno = 3 (0x3), region = 221 }
 0x1c1   :  { %1103 = vsyncpa [#allocation12], 1 }
 0x1c2   :  { %1105 = vsyncpa [#allocation12 + $0x1], 1 }
 0x1c3   :  { %1106 = vsyncpa [#allocation14], 1 }

</bundles_post_ra>
